<compile_context>
chip_gen: v7x
topology: tpu7x:2x2x1
jax: 0.10.0
libtpu: 0.0.40
codegen_flags: <defaults>
</compile_context>

<pallas_src>
import functools
import math

import jax
import jax.numpy as jnp
import numpy as np
from jax import lax
from jax.experimental import pallas as pl
from jax.experimental.pallas import tpu as pltpu

NEG_INF = -1e30          # finite mask value -> no NaNs on fully-masked tiles
_LANES = 128


def _round_up(x, m):
    return (x + m - 1) // m * m


def _vmem_capacity_bytes():
    """Best-effort VMEM capacity query; conservative fallback (safe on v7x)."""
    try:
        info = pltpu.get_tpu_info()
        for name in ("vmem_capacity_bytes", "vmem_size_bytes", "vmem_bytes"):
            cap = getattr(info, name, None)
            if cap:
                return int(cap)
    except Exception:
        pass
    return 64 * 1024 * 1024


# --------------------------------------------------------------------------
# Phase 1: fused Q/K/V projection — one MXU matmul against [Wq|Wk|Wv]
# --------------------------------------------------------------------------
def _qkv_proj_kernel(x_ref, w_ref, b_ref, q_ref, k_ref, v_ref, *, dp, inv_scale):
    x = x_ref[0]                                              # (tm, Dp) bf16
    y = jnp.dot(x, w_ref[...], preferred_element_type=jnp.float32)
    y = y + b_ref[...]                                        # (tm, 3*Dp) f32
    q_ref[0] = (y[:, :dp] * inv_scale).astype(q_ref.dtype)    # fold 1/sqrt(D) into Q
    k_ref[0] = y[:, dp:2 * dp].astype(k_ref.dtype)
    v_ref[0] = y[:, 2 * dp:].astype(v_ref.dtype)


# --------------------------------------------------------------------------
# Phase 2: flash-style LSH attention over bucket-sorted tokens
# --------------------------------------------------------------------------
def _lsh_flash_kernel(kvstart_ref, kvnum_ref, q_ref, k_ref, v_ref, qb_ref, kb_ref,
                      o_ref, m_ref, l_ref, acc_ref):
    b = pl.program_id(0)
    qi = pl.program_id(1)
    j = pl.program_id(2)

    @pl.when(j == 0)
    def _init():
        m_ref[...] = jnp.full_like(m_ref, NEG_INF)
        l_ref[...] = jnp.zeros_like(l_ref)
        acc_ref[...] = jnp.zeros_like(acc_ref)

    # Only key tiles inside this q-tile's bucket range do any work.
    @pl.when(j < kvnum_ref[b, qi])
    def _compute():
        q = q_ref[0]                                          # (tq, Dp) bf16, pre-scaled
        k = k_ref[0]                                          # (tk, Dp) bf16
        # Contract D axes directly -> no explicit K^T materialization.
        s = lax.dot_general(q, k, dimension_numbers=(((1,), (1,)), ((), ())),
                            preferred_element_type=jnp.float32)    # (tq, tk) f32

        mask = qb_ref[0] == kb_ref[0]                         # (tq, tk) == (1, tk)
        s = jnp.where(mask, s, NEG_INF)

        m_prev = m_ref[...]                                   # (tq, 1) f32
        m_new = jnp.maximum(m_prev, jnp.max(s, axis=-1, keepdims=True))
        alpha = jnp.exp(m_prev - m_new)
        p = jnp.exp(s - m_new)
        p = jnp.where(mask, p, 0.0)                           # hardening: masked -> exactly 0
        l_ref[...] = alpha * l_ref[...] + jnp.sum(p, axis=-1, keepdims=True)
        acc_ref[...] = alpha * acc_ref[...] + jnp.dot(
            p.astype(v_ref.dtype), v_ref[0], preferred_element_type=jnp.float32)
        m_ref[...] = m_new

    @pl.when(j == pl.num_programs(2) - 1)
    def _finalize():
        l = l_ref[...]
        l = jnp.where(l > 0.0, l, 1.0)                        # unmatched rows -> 0, not NaN
        o_ref[0] = (acc_ref[...] / l).astype(o_ref.dtype)     # exact divide, once per tile


# --------------------------------------------------------------------------
# Wrapper
# --------------------------------------------------------------------------
def lsh_attention(hidden_states, wq_t, wk_t, wv_t, bq, bk, bv, hash_buckets,
                  *, num_hashes=8, tq=256, tk=512):
    """hidden_states: (B, T, D); w*_t: (D, D) pre-transposed (x @ Wt + b);
    b*: (D,); hash_buckets: (B, T) int32 in [0, num_hashes)."""
    B, T, D = hidden_states.shape
    inv_scale = 1.0 / float(np.sqrt(D))
    Dp = _round_up(D, _LANES)

    # ---- generation-aware tile / VMEM budget --------------------------------
    vmem_cap = _vmem_capacity_bytes()
    vmem_limit = min(int(0.75 * vmem_cap), 100 * 1024 * 1024)  # ~48MiB v7x, ~96MiB v5e/v6e
    budget = int(0.6 * vmem_limit)

    t128 = _round_up(T, _LANES)
    tq = min(tq, t128)
    tk = min(tk, t128)

    def p2_bytes(_tq, _tk):           # double-buffered ins/outs + scratch
        return (2 * _tq * Dp * 2 + 2 * 2 * _tk * Dp * 2 + 2 * _tq * _tk * 4
                + 2 * _tk * 4 + 2 * _tq * Dp * 2 + _tq * Dp * 4 + 4 * _tq * 4)

    while p2_bytes(tq, tk) > budget and tk > _LANES:
        tk = max(_LANES, (tk // 2) // _LANES * _LANES)
    while p2_bytes(tq, tk) > budget and tq > _LANES:
        tq = max(_LANES, (tq // 2) // _LANES * _LANES)

    Tp = _round_up(T, math.lcm(tq, tk))
    nq, nk = Tp // tq, Tp // tk

    # ---- pad + sort tokens by bucket (LSH sparsity) --------------------------
    x = jnp.pad(hidden_states.astype(jnp.bfloat16),
                ((0, 0), (0, Tp - T), (0, Dp - D)))            # bf16 input (halved DMA)
    # Padding bucket `num_hashes` is never a real bucket: padded keys never
    # match real queries; padded rows still self-match (denominator > 0).
    hb = jnp.pad(hash_buckets.astype(jnp.int32), ((0, 0), (0, Tp - T)),
                 constant_values=num_hashes)

    sort_idx = jnp.argsort(hb, axis=-1)                        # (B, Tp) ascending bucket
    inv_idx = jnp.argsort(sort_idx, axis=-1)
    sb = jnp.take_along_axis(hb, sort_idx, axis=-1)            # sorted buckets
    x = jnp.take_along_axis(x, sort_idx[..., None], axis=1)    # sorted tokens

    # Per-(batch, q-tile) contiguous key-tile range that can share a bucket.
    sb_tiles = sb.reshape(B, nq, tq)
    qb_lo, qb_hi = sb_tiles[:, :, 0], sb_tiles[:, :, -1]
    k_lo = jax.vmap(lambda row, v: jnp.searchsorted(row, v, side="left"))(sb, qb_lo)
    k_hi = jax.vmap(lambda row, v: jnp.searchsorted(row, v, side="right"))(sb, qb_hi) - 1
    kv_start = (k_lo // tk).astype(jnp.int32)                  # (B, nq)
    kv_num = (k_hi // tk - k_lo // tk + 1).astype(jnp.int32)   # (B, nq), >= 1

    qb_bcast = lax.broadcast_in_dim(sb, (B, Tp, tk), (0, 1))   # q-side, lane width = tk
    kb_row = sb.reshape(B, 1, Tp)                              # k-side, lane-dense row

    # ---- Phase 1: fused QKV projection ---------------------------------------
    pad_w = lambda w: jnp.pad(w.astype(jnp.float32), ((0, Dp - D), (0, Dp - D)))
    pad_b = lambda v: jnp.pad(v.astype(jnp.float32), (0, Dp - D))
    w_fused = jnp.concatenate([pad_w(wq_t), pad_w(wk_t), pad_w(wv_t)],
                              axis=1).astype(jnp.bfloat16)      # (Dp, 3*Dp) bf16
    b_fused = jnp.concatenate([pad_b(bq), pad_b(bk), pad_b(bv)]).reshape(1, 3 * Dp)

    def p1_bytes(_tm):
        return Dp * 3 * Dp * 2 + 3 * Dp * 4 + 2 * _tm * Dp * 2 + 3 * 2 * _tm * Dp * 2

    tm1 = _LANES
    for c in (1024, 512, 256, 128):
        if Tp % c == 0 and p1_bytes(c) <= budget:
            tm1 = c
            break
    nm = Tp // tm1

    qkv_shape = jax.ShapeDtypeStruct((B, Tp, Dp), jnp.bfloat16)
    proj_kernel = functools.partial(_qkv_proj_kernel, dp=Dp, inv_scale=inv_scale)

    def run_phase1(const_mode):
        def const_spec(shape):
            if const_mode is None:
                return pl.BlockSpec(shape, lambda b, i: (0, 0))
            return pl.BlockSpec(shape, lambda b, i: (0, 0), pipeline_mode=const_mode)

        return pl.pallas_call(
            proj_kernel,
            out_shape=(qkv_shape, qkv_shape, qkv_shape),
            grid_spec=pltpu.PrefetchScalarGridSpec(
                num_scalar_prefetch=0,
                grid=(B, nm),
                in_specs=[
                    pl.BlockSpec((1, tm1, Dp), lambda b, i: (b, i, 0)),  # x (bf16, sorted)
                    const_spec((Dp, 3 * Dp)),                            # [Wq|Wk|Wv]^T bf16
                    const_spec((1, 3 * Dp)),                             # [bq|bk|bv] f32
                ],
                out_specs=[
                    pl.BlockSpec((1, tm1, Dp), lambda b, i: (b, i, 0)),
                    pl.BlockSpec((1, tm1, Dp), lambda b, i: (b, i, 0)),
                    pl.BlockSpec((1, tm1, Dp), lambda b, i: (b, i, 0)),
                ],
            ),
            compiler_params=pltpu.CompilerParams(
                dimension_semantics=("parallel", "parallel"),
                vmem_limit_bytes=vmem_limit),
        )(x, w_fused, b_fused)

    try:
        # Weights/biases never change across the grid -> single-buffer them
        # (halves resident weight VMEM; matters on v7x's 64 MiB).
        q, k, v = run_phase1(pl.Buffered(1))
    except Exception:
        q, k, v = run_phase1(None)

    # ---- Phase 2: flash LSH attention with key-tile skipping -----------------
    def kv_block(b, i, j, start_ref, num_ref):
        last = jnp.maximum(num_ref[b, i] - 1, 0)
        return start_ref[b, i] + jnp.minimum(j, last)          # repeats index when skipping

    def kv_map(b, i, j, s, n):
        return (b, kv_block(b, i, j, s, n), 0)

    def kb_map(b, i, j, s, n):
        return (b, 0, kv_block(b, i, j, s, n))

    out_sorted = pl.pallas_call(
        _lsh_flash_kernel,
        out_shape=jax.ShapeDtypeStruct((B, Tp, Dp), jnp.bfloat16),  # bf16 writeback
        grid_spec=pltpu.PrefetchScalarGridSpec(
            num_scalar_prefetch=2,
            grid=(B, nq, nk),
            in_specs=[
                pl.BlockSpec((1, tq, Dp), lambda b, i, j, s, n: (b, i, 0)),   # q
                pl.BlockSpec((1, tk, Dp), kv_map),                            # k
                pl.BlockSpec((1, tk, Dp), kv_map),                            # v
                pl.BlockSpec((1, tq, tk), lambda b, i, j, s, n: (b, i, 0)),   # q buckets
                pl.BlockSpec((1, 1, tk), kb_map),                             # k buckets
            ],
            out_specs=pl.BlockSpec((1, tq, Dp), lambda b, i, j, s, n: (b, i, 0)),
            scratch_shapes=[
                pltpu.VMEM((tq, 1), jnp.float32),      # running max m
                pltpu.VMEM((tq, 1), jnp.float32),      # running sum l
                pltpu.VMEM((tq, Dp), jnp.float32),     # output accumulator
            ],
        ),
        compiler_params=pltpu.CompilerParams(
            dimension_semantics=("parallel", "parallel", "arbitrary"),
            vmem_limit_bytes=vmem_limit),
    )(kv_start, kv_num, q, k, v, qb_bcast, kb_row)

    # Un-permute back to the original token order, drop padding.
    out = jnp.take_along_axis(out_sorted, inv_idx[..., None], axis=1)
    return out[:, :T, :D].astype(hidden_states.dtype)


def _reference(hidden_states, wq_t, wk_t, wv_t, bq, bk, bv, hash_buckets):
    """Pure-JAX f32 reference mirroring the PyTorch forward."""
    D = hidden_states.shape[-1]
    scale = jnp.sqrt(jnp.float32(D))
    q = hidden_states @ wq_t + bq
    k = hidden_states @ wk_t + bk
    v = hidden_states @ wv_t + bv
    scores = jnp.einsum("btd,bsd->bts", q, k) / scale
    same = hash_buckets[:, :, None] == hash_buckets[:, None, :]
    scores = jnp.where(same, scores, -jnp.inf)
    probs = jax.nn.softmax(scores, axis=-1)
    return jnp.einsum("bts,bsd->btd", probs, v)


if __name__ == "__main__":
    B, T, D = 2, 8, 32          # batch, seq, n_embd
    num_hashes = 8

    key = jax.random.PRNGKey(0)
    kx, kwq, kwk, kwv, kbq, kbk, kbv, kh = jax.random.split(key, 8)

    hidden_states = jax.random.normal(kx, (B, T, D), dtype=jnp.float32)

    # nn.Linear(n_embd, n_embd)-shaped params, stored pre-transposed (D_in, D_out).
    bound = 1.0 / np.sqrt(D)
    wq_t = jax.random.uniform(kwq, (D, D), jnp.float32, -bound, bound)
    wk_t = jax.random.uniform(kwk, (D, D), jnp.float32, -bound, bound)
    wv_t = jax.random.uniform(kwv, (D, D), jnp.float32, -bound, bound)
    bq = jax.random.uniform(kbq, (D,), jnp.float32, -bound, bound)
    bk = jax.random.uniform(kbk, (D,), jnp.float32, -bound, bound)
    bv = jax.random.uniform(kbv, (D,), jnp.float32, -bound, bound)

    # torch.randint(0, num_hashes, (B, T)) equivalent, as explicit input.
    hash_buckets = jax.random.randint(kh, (B, T), 0, num_hashes, dtype=jnp.int32)

    out = lsh_attention(hidden_states, wq_t, wk_t, wv_t, bq, bk, bv,
                        hash_buckets, num_hashes=num_hashes)
    out = jax.block_until_ready(out)

    ref = _reference(hidden_states, wq_t, wk_t, wv_t, bq, bk, bv, hash_buckets)
    # Tolerance reflects bf16 MXU operands / bf16 output (f32 accumulation).
    np.testing.assert_allclose(np.asarray(out), np.asarray(ref),
                               rtol=3e-2, atol=3e-2)

    print("KERNEL_OK")
</pallas_src>

<mosaic_0001>
module attributes {stable_mosaic.version = 11 : i64} {
  func.func @_qkv_proj_kernel(%arg0: i32, %arg1: i32, %arg2: memref<1x128x128xbf16, #tpu.memory_space<vmem>>, %arg3: memref<128x384xbf16, #tpu.memory_space<vmem>>, %arg4: memref<1x384xf32, #tpu.memory_space<vmem>>, %arg5: memref<1x128x128xbf16, #tpu.memory_space<vmem>>, %arg6: memref<1x128x128xbf16, #tpu.memory_space<vmem>>, %arg7: memref<1x128x128xbf16, #tpu.memory_space<vmem>>) attributes {dimension_semantics = [#tpu.dimension_semantics<parallel>, #tpu.dimension_semantics<parallel>], iteration_bounds = array<i64: 2, 1>, scalar_prefetch = 0 : i64, scratch_operands = 0 : i64, tpu.core_type = #tpu.core_type<tc>, window_params = [{transform_indices = @transform_0, window_bounds = array<i64: 1, 128, 128>}, {pipeline_mode = #tpu.pipeline_mode<synchronous>, transform_indices = @transform_1, window_bounds = array<i64: 128, 384>}, {pipeline_mode = #tpu.pipeline_mode<synchronous>, transform_indices = @transform_2, window_bounds = array<i64: 1, 384>}, {transform_indices = @transform_3, window_bounds = array<i64: 1, 128, 128>}, {transform_indices = @transform_4, window_bounds = array<i64: 1, 128, 128>}, {transform_indices = @transform_5, window_bounds = array<i64: 1, 128, 128>}]} {
    %c0 = arith.constant 0 : index
    %c0_0 = arith.constant 0 : index
    %c0_1 = arith.constant 0 : index
    %0 = vector.load %arg2[%c0, %c0_0, %c0_1] : memref<1x128x128xbf16, #tpu.memory_space<vmem>>, vector<1x128x128xbf16>
    %1 = vector.shape_cast %0 : vector<1x128x128xbf16> to vector<128x128xbf16>
    %c0_2 = arith.constant 0 : index
    %c0_3 = arith.constant 0 : index
    %2 = vector.load %arg3[%c0_2, %c0_3] : memref<128x384xbf16, #tpu.memory_space<vmem>>, vector<128x384xbf16>
    %cst = arith.constant dense<0.000000e+00> : vector<128x384xf32>
    %3 = tpu.matmul %1, %2, %cst {dimension_numbers = #tpu.dot_dimension_numbers<[1], [0], [0], [1], [0, 0, 1, 1], [], []>} : vector<128x128xbf16>, vector<128x384xbf16>, vector<128x384xf32> -> vector<128x384xf32>
    %c0_4 = arith.constant 0 : index
    %c0_5 = arith.constant 0 : index
    %4 = vector.load %arg4[%c0_4, %c0_5] : memref<1x384xf32, #tpu.memory_space<vmem>>, vector<1x384xf32>
    %5 = vector.broadcast %4 : vector<1x384xf32> to vector<128x384xf32>
    %6 = arith.addf %3, %5 : vector<128x384xf32>
    %7 = vector.extract_strided_slice %6 {offsets = [0, 0], sizes = [128, 128], strides = [1, 1]} : vector<128x384xf32> to vector<128x128xf32>
    %cst_6 = arith.constant 0.176776692 : f32
    %8 = vector.broadcast %cst_6 : f32 to vector<128x128xf32>
    %9 = arith.mulf %7, %8 : vector<128x128xf32>
    %10 = arith.truncf %9 : vector<128x128xf32> to vector<128x128xbf16>
    %c0_7 = arith.constant 0 : index
    %c0_8 = arith.constant 0 : index
    %c0_9 = arith.constant 0 : index
    %11 = vector.load %arg5[%c0_7, %c0_8, %c0_9] : memref<1x128x128xbf16, #tpu.memory_space<vmem>>, vector<1x128x128xbf16>
    %12 = vector.shape_cast %11 : vector<1x128x128xbf16> to vector<128x128xbf16>
    %13 = vector.shape_cast %10 : vector<128x128xbf16> to vector<1x128x128xbf16>
    tpu.vector_store %arg5[%c0_7, %c0_8, %c0_9], %13 {strides = array<i32>} : memref<1x128x128xbf16, #tpu.memory_space<vmem>>, vector<1x128x128xbf16>,
    %14 = vector.extract_strided_slice %6 {offsets = [0, 128], sizes = [128, 128], strides = [1, 1]} : vector<128x384xf32> to vector<128x128xf32>
    %15 = arith.truncf %14 : vector<128x128xf32> to vector<128x128xbf16>
    %c0_10 = arith.constant 0 : index
    %c0_11 = arith.constant 0 : index
    %c0_12 = arith.constant 0 : index
    %16 = vector.load %arg6[%c0_10, %c0_11, %c0_12] : memref<1x128x128xbf16, #tpu.memory_space<vmem>>, vector<1x128x128xbf16>
    %17 = vector.shape_cast %16 : vector<1x128x128xbf16> to vector<128x128xbf16>
    %18 = vector.shape_cast %15 : vector<128x128xbf16> to vector<1x128x128xbf16>
    tpu.vector_store %arg6[%c0_10, %c0_11, %c0_12], %18 {strides = array<i32>} : memref<1x128x128xbf16, #tpu.memory_space<vmem>>, vector<1x128x128xbf16>,
    %19 = vector.extract_strided_slice %6 {offsets = [0, 256], sizes = [128, 128], strides = [1, 1]} : vector<128x384xf32> to vector<128x128xf32>
    %20 = arith.truncf %19 : vector<128x128xf32> to vector<128x128xbf16>
    %c0_13 = arith.constant 0 : index
    %c0_14 = arith.constant 0 : index
    %c0_15 = arith.constant 0 : index
    %21 = vector.load %arg7[%c0_13, %c0_14, %c0_15] : memref<1x128x128xbf16, #tpu.memory_space<vmem>>, vector<1x128x128xbf16>
    %22 = vector.shape_cast %21 : vector<1x128x128xbf16> to vector<128x128xbf16>
    %23 = vector.shape_cast %20 : vector<128x128xbf16> to vector<1x128x128xbf16>
    tpu.vector_store %arg7[%c0_13, %c0_14, %c0_15], %23 {strides = array<i32>} : memref<1x128x128xbf16, #tpu.memory_space<vmem>>, vector<1x128x128xbf16>,
    return
  }
  func.func @transform_0(%arg0: i32, %arg1: i32) -> (i32, i32, i32) {
    %c0_i32 = arith.constant 0 : i32
    %c0_i32_0 = arith.constant 0 : i32
    return %arg0, %arg1, %c0_i32 : i32, i32, i32
  }
  func.func @transform_1(%arg0: i32, %arg1: i32) -> (i32, i32) {
    %c0_i32 = arith.constant 0 : i32
    %c0_i32_0 = arith.constant 0 : i32
    %c0_i32_1 = arith.constant 0 : i32
    return %c0_i32, %c0_i32_0 : i32, i32
  }
  func.func @transform_2(%arg0: i32, %arg1: i32) -> (i32, i32) {
    %c0_i32 = arith.constant 0 : i32
    %c0_i32_0 = arith.constant 0 : i32
    %c0_i32_1 = arith.constant 0 : i32
    return %c0_i32, %c0_i32_0 : i32, i32
  }
  func.func @transform_3(%arg0: i32, %arg1: i32) -> (i32, i32, i32) {
    %c0_i32 = arith.constant 0 : i32
    %c0_i32_0 = arith.constant 0 : i32
    return %arg0, %arg1, %c0_i32 : i32, i32, i32
  }
  func.func @transform_4(%arg0: i32, %arg1: i32) -> (i32, i32, i32) {
    %c0_i32 = arith.constant 0 : i32
    %c0_i32_0 = arith.constant 0 : i32
    return %arg0, %arg1, %c0_i32 : i32, i32, i32
  }
  func.func @transform_5(%arg0: i32, %arg1: i32) -> (i32, i32, i32) {
    %c0_i32 = arith.constant 0 : i32
    %c0_i32_0 = arith.constant 0 : i32
    return %arg0, %arg1, %c0_i32 : i32, i32, i32
  }
}

module attributes {stable_mosaic.version = 11 : i64} {
  func.func @_qkv_proj_kernel(%arg0: i32, %arg1: i32, %arg2: memref<1x128x128xbf16, #tpu.memory_space<vmem>>, %arg3: memref<128x384xbf16, #tpu.memory_space<vmem>>, %arg4: memref<1x384xf32, #tpu.memory_space<vmem>>, %arg5: memref<1x128x128xbf16, #tpu.memory_space<vmem>>, %arg6: memref<1x128x128xbf16, #tpu.memory_space<vmem>>, %arg7: memref<1x128x128xbf16, #tpu.memory_space<vmem>>) attributes {dimension_semantics = [#tpu.dimension_semantics<parallel>, #tpu.dimension_semantics<parallel>], iteration_bounds = array<i64: 2, 1>, scalar_prefetch = 0 : i64, scratch_operands = 0 : i64, tpu.core_type = #tpu.core_type<tc>, window_params = [{transform_indices = @transform_0, window_bounds = array<i64: 1, 128, 128>}, {pipeline_mode = #tpu.pipeline_mode<synchronous>, transform_indices = @transform_1, window_bounds = array<i64: 128, 384>}, {pipeline_mode = #tpu.pipeline_mode<synchronous>, transform_indices = @transform_2, window_bounds = array<i64: 1, 384>}, {transform_indices = @transform_3, window_bounds = array<i64: 1, 128, 128>}, {transform_indices = @transform_4, window_bounds = array<i64: 1, 128, 128>}, {transform_indices = @transform_5, window_bounds = array<i64: 1, 128, 128>}]} {
    %c0 = arith.constant 0 : index
    %c0_0 = arith.constant 0 : index
    %c0_1 = arith.constant 0 : index
    %0 = vector.load %arg2[%c0, %c0_0, %c0_1] : memref<1x128x128xbf16, #tpu.memory_space<vmem>>, vector<1x128x128xbf16>
    %1 = vector.shape_cast %0 : vector<1x128x128xbf16> to vector<128x128xbf16>
    %c0_2 = arith.constant 0 : index
    %c0_3 = arith.constant 0 : index
    %2 = vector.load %arg3[%c0_2, %c0_3] : memref<128x384xbf16, #tpu.memory_space<vmem>>, vector<128x384xbf16>
    %cst = arith.constant dense<0.000000e+00> : vector<128x384xf32>
    %3 = tpu.matmul %1, %2, %cst {dimension_numbers = #tpu.dot_dimension_numbers<[1], [0], [0], [1], [0, 0, 1, 1], [], []>} : vector<128x128xbf16>, vector<128x384xbf16>, vector<128x384xf32> -> vector<128x384xf32>
    %c0_4 = arith.constant 0 : index
    %c0_5 = arith.constant 0 : index
    %4 = vector.load %arg4[%c0_4, %c0_5] : memref<1x384xf32, #tpu.memory_space<vmem>>, vector<1x384xf32>
    %5 = vector.broadcast %4 : vector<1x384xf32> to vector<128x384xf32>
    %6 = arith.addf %3, %5 : vector<128x384xf32>
    %7 = vector.extract_strided_slice %6 {offsets = [0, 0], sizes = [128, 128], strides = [1, 1]} : vector<128x384xf32> to vector<128x128xf32>
    %cst_6 = arith.constant 0.176776692 : f32
    %8 = vector.broadcast %cst_6 : f32 to vector<128x128xf32>
    %9 = arith.mulf %7, %8 : vector<128x128xf32>
    %10 = arith.truncf %9 : vector<128x128xf32> to vector<128x128xbf16>
    %c0_7 = arith.constant 0 : index
    %c0_8 = arith.constant 0 : index
    %c0_9 = arith.constant 0 : index
    %11 = vector.load %arg5[%c0_7, %c0_8, %c0_9] : memref<1x128x128xbf16, #tpu.memory_space<vmem>>, vector<1x128x128xbf16>
    %12 = vector.shape_cast %11 : vector<1x128x128xbf16> to vector<128x128xbf16>
    %13 = vector.shape_cast %10 : vector<128x128xbf16> to vector<1x128x128xbf16>
    tpu.vector_store %arg5[%c0_7, %c0_8, %c0_9], %13 {strides = array<i32>} : memref<1x128x128xbf16, #tpu.memory_space<vmem>>, vector<1x128x128xbf16>,
    %14 = vector.extract_strided_slice %6 {offsets = [0, 128], sizes = [128, 128], strides = [1, 1]} : vector<128x384xf32> to vector<128x128xf32>
    %15 = arith.truncf %14 : vector<128x128xf32> to vector<128x128xbf16>
    %c0_10 = arith.constant 0 : index
    %c0_11 = arith.constant 0 : index
    %c0_12 = arith.constant 0 : index
    %16 = vector.load %arg6[%c0_10, %c0_11, %c0_12] : memref<1x128x128xbf16, #tpu.memory_space<vmem>>, vector<1x128x128xbf16>
    %17 = vector.shape_cast %16 : vector<1x128x128xbf16> to vector<128x128xbf16>
    %18 = vector.shape_cast %15 : vector<128x128xbf16> to vector<1x128x128xbf16>
    tpu.vector_store %arg6[%c0_10, %c0_11, %c0_12], %18 {strides = array<i32>} : memref<1x128x128xbf16, #tpu.memory_space<vmem>>, vector<1x128x128xbf16>,
    %19 = vector.extract_strided_slice %6 {offsets = [0, 256], sizes = [128, 128], strides = [1, 1]} : vector<128x384xf32> to vector<128x128xf32>
    %20 = arith.truncf %19 : vector<128x128xf32> to vector<128x128xbf16>
    %c0_13 = arith.constant 0 : index
    %c0_14 = arith.constant 0 : index
    %c0_15 = arith.constant 0 : index
    %21 = vector.load %arg7[%c0_13, %c0_14, %c0_15] : memref<1x128x128xbf16, #tpu.memory_space<vmem>>, vector<1x128x128xbf16>
    %22 = vector.shape_cast %21 : vector<1x128x128xbf16> to vector<128x128xbf16>
    %23 = vector.shape_cast %20 : vector<128x128xbf16> to vector<1x128x128xbf16>
    tpu.vector_store %arg7[%c0_13, %c0_14, %c0_15], %23 {strides = array<i32>} : memref<1x128x128xbf16, #tpu.memory_space<vmem>>, vector<1x128x128xbf16>,
    return
  }
  func.func @transform_0(%arg0: i32, %arg1: i32) -> (i32, i32, i32) {
    %c0_i32 = arith.constant 0 : i32
    %c0_i32_0 = arith.constant 0 : i32
    return %arg0, %arg1, %c0_i32 : i32, i32, i32
  }
  func.func @transform_1(%arg0: i32, %arg1: i32) -> (i32, i32) {
    %c0_i32 = arith.constant 0 : i32
    %c0_i32_0 = arith.constant 0 : i32
    %c0_i32_1 = arith.constant 0 : i32
    return %c0_i32, %c0_i32_0 : i32, i32
  }
  func.func @transform_2(%arg0: i32, %arg1: i32) -> (i32, i32) {
    %c0_i32 = arith.constant 0 : i32
    %c0_i32_0 = arith.constant 0 : i32
    %c0_i32_1 = arith.constant 0 : i32
    return %c0_i32, %c0_i32_0 : i32, i32
  }
  func.func @transform_3(%arg0: i32, %arg1: i32) -> (i32, i32, i32) {
    %c0_i32 = arith.constant 0 : i32
    %c0_i32_0 = arith.constant 0 : i32
    return %arg0, %arg1, %c0_i32 : i32, i32, i32
  }
  func.func @transform_4(%arg0: i32, %arg1: i32) -> (i32, i32, i32) {
    %c0_i32 = arith.constant 0 : i32
    %c0_i32_0 = arith.constant 0 : i32
    return %arg0, %arg1, %c0_i32 : i32, i32, i32
  }
  func.func @transform_5(%arg0: i32, %arg1: i32) -> (i32, i32, i32) {
    %c0_i32 = arith.constant 0 : i32
    %c0_i32_0 = arith.constant 0 : i32
    return %arg0, %arg1, %c0_i32 : i32, i32, i32
  }
}

</mosaic_0001>

<bundles_post_ra>
// kernel: tpu_custom_call.1
= control target key start
LH: loop header
LB: loop body
LE: loop exit
PB: predicated region body
PF: predicated region fallthrough
CT: control target
= control target key end

     0   :  { %s2363_s0 = inlined_call_operand.hbm [shape: bf16[2,128,128], index: 0, kind: input, shape index: {}]   ;;  %s2364_s1 = inlined_call_operand.hbm [shape: bf16[128,384], index: 1, kind: input, shape index: {}]   ;;  %s2365_s2 = inlined_call_operand.vmem [shape: f32[1,384], index: 2, kind: input, shape index: {}]   ;;  %s2366_s3 = inlined_call_operand.hbm [shape: bf16[2,128,128], index: 3, kind: output, shape index: {0}]   ;;  %s2367_s4 = inlined_call_operand.hbm [shape: bf16[2,128,128], index: 4, kind: output, shape index: {1}]   ;;  %s2368_s5 = inlined_call_operand.hbm [shape: bf16[2,128,128], index: 5, kind: output, shape index: {2}]  }
   0x1   :  { %2373 = sst [smem:[#allocation15_spill]] %s2363_s0 }
   0x2   :  { %2374 = sst [smem:[#allocation16_spill]] %s2364_s1 }
   0x3   :  { %11 = vsyncpa [#allocation3], 0 }
   0x4   :  { %13 = vsyncpa [#allocation3 + $0x1], 0 }
   0x5   :  { %14 = vsyncpa [#allocation6], 0 }
   0x6   :  { %15 = vsyncpa [#allocation4], 0 }
   0x7   :  { %17 = vsyncpa [#allocation4 + $0x1], 0 }
   0x8   :  { %18 = vsyncpa [#allocation9], 0 }
   0x9   :  { %20 = vsyncpa [#allocation9 + $0x1], 0  ;;  %s1960_s18 = smov 0   ;;  %s1962_s19 = smov 0  }
   0xa   :  { %s1964_s20 = smov 0   ;;  %s1966_s21 = smov 0  }
   0xb   :  { %s1968_s22 = smov 0   ;;  %s1970_s23 = smov 0  }
   0xc LB: > { %s1991_s24 = sadd.s32 4294967295, %s1916_s23   ;;  %s2372_s25 = sadd.s32 4294967294, %s1916_s23   ;;  %s1916_s23 = sphi %s1970_s23, %s26_s23   ;;  %s1912_s22 = sphi %s1968_s22, %s2396_s22   ;;  %s1908_s21 = sphi %s1966_s21, %s2395_s21   ;;  %s1904_s20 = sphi %s1964_s20, %s2394_s20   ;;  %s1900_s19 = sphi %s1962_s19, %s2393_s19   ;;  %s1896_s18 = sphi %s1960_s18, %s2392_s18  }
   0xd   : > { %p60_p0 = scmp.ne.s32.totalorder %s1900_s19, %s1896_s18  ;;  %p2369_p1 = scmp.eq.s32.totalorder %s1991_s24, 0 }
   0xe   : > { %p134_p3 = scmp.eq.s32.totalorder %s2372_s25, 1  ;;  %p1238_p5 = scmp.ge.s32.totalorder %s1916_s23, 1 }
   0xf   : > { %p2002_p4 = por %p2369_p1, %p60_p0  ;;  %p197_p7 = scmp.lt.s32.totalorder %s1916_s23, 3 }
  0x10   : > { %p2007_p6 = por %p134_p3, %p60_p0  ;;  %s1918_s29 = smov [#allocation5]  }
  0x11   : > { %s2375_s26 = scalar_select %p2002_p4, 1, 0 }
  0x12   : > { %s2376_s27 = scalar_select %p2007_p6, 1, 0 }
  0x13   : > { %p2012_p8 = pnand %p1238_p5, %p197_p7  ;;  %s209_s30 = sshll.u32 %s1918_s29, 4  ;;  %s210_s30 = int_to_ptr.vmem [resolvable:$true] %s209_s30 }
  0x14   : > { %s38_s7 = sadd.s32 1, %s1912_s22  ;;  %s2379_s1 = sld [smem:[#allocation16_spill]] }
  0x15   : > { %s2377_s28 = scalar_select %p2012_p8, 1, 0 }
  0x16   : > { %p1594_p9 = pneg %p2012_p8 }
  0x18   : > { %p2021_p11 = pnand %p1594_p9, %p2369_p1 }
  0x1a   : > { %s1712_s10 = scalar_lea.hbm %s2379_s1, 3072  ;;  %p1714_p13 = pneg %p2021_p11 }
  0x1b   : > { %p1713_p12 = scmp.ne.s32.totalorder %s2379_s1, %s1712_s10  ;;  %p1719_p5 = scmp.lt.u32.totalorder %s1712_s10, %s2379_s1 }
  0x1d   : > { %p1715_p0 = pnand %p1714_p13, %p1713_p12 }
  0x1f   : > { %p1716_p3 = pneg %p1715_p0 }
  0x21   : > { %p1721_p7 = pnand %p1719_p5, %p1716_p3 }
  0x23   : > { %1724 = shalt.err (!%p1721_p7)
}
  0x24   : > { %s1725_s15 = scalar_lea.vmem %s210_s30, 3072  ;;  %p1733_p2 = scmp.lt.s32.totalorder %s210_s30, %s210_s30 }
  0x25   : > { %p1726_p9 = scmp.ne.s32.totalorder %s210_s30, %s1725_s15  ;;  %p1734_p6 = scmp.lt.s32.totalorder %s1725_s15, %s1725_s15 }
  0x27   : > { %p1728_p10 = pnand %p1726_p9, %p1714_p13  ;;  %p1735_p4 = por %p1734_p6, %p1733_p2 }
  0x29   : > { %p1729_p1 = pneg %p1728_p10 }
  0x2b   : > { %p1736_p8 = pnand %p1735_p4, %p1729_p1 }
  0x2d   : > { %1739 = shalt.err (!%p1736_p8)
}
  0x2e   : > { %s1919_s16 = smov 192   ;;  %s1920_s17 = smov 12  }
  0x2f   : > { %1597 = dma.hbm_to_vmem [thread:$0]  (!%p2021_p11), %s2379_s1, 3072, %s210_s30, [#allocation6], %s1919_s16, %s1919_s16, %s1920_s17  }
  0x30   : > { %p40_p1 = scmp.ge.s32.totalorder %s38_s7, 2  ;;  %s47_s9 = sadd.s32 1, %s1904_s20 }
  0x31   : > { %p54_p2 = scmp.ne.s32.totalorder %s1904_s20, %s1900_s19  ;;  %p55_p4 = scmp.eq.s32.totalorder %s1916_s23, 0 }
  0x32   : > { %s2398_s7 = smov (%p40_p1, %s38_s7), 0  ;;  %p2381_p8 = scmp.eq.s32.totalorder %s1991_s24, 1 }
  0x33   : > { %p2048_p6 = por %p55_p4, %p54_p2  ;;  %s42_s6 = ssub.s32 %s1912_s22, %s2398_s7 }
  0x34   : > { %p2054_p10 = por %p2381_p8, %p54_p2  ;;  %p1613_p12 = scmp.lt.s32.totalorder %s1916_s23, 2 }
  0x35   : > { %p45_p11 = scmp.eq.s32.totalorder %s42_s6, 0  ;;  %s226_s30 = sand.u32 1, %s1904_s20  }
  0x36   : > { %s1241_s12 = sshll.u32 %s226_s30, 6  ;;  %s1341_s14 = sshll.u32 %s1912_s22, 10 }
  0x37   : > { %s2063_s13 = scalar_select %p45_p11, %s1904_s20, %s47_s9  }
  0x38   : > { %s2383_s0 = sld [smem:[#allocation15_spill]]  ;;  %s230_s29 = scalar_lea.vmem [#allocation2], %s1241_s12 }
  0x39   : > { %s239_s8 = sshll.u32 %s230_s29, 4  ;;  %p2075_p13 = pnand %p1613_p12, %p2048_p6  ;;  %s2071_s8 = int_to_ptr.vmem [resolvable:$true] %s239_s8 }
  0x3a   : > { %s2079_s9 = scalar_lea.sflag [#allocation3], %s226_s30 }
  0x3b   : > { %p1742_p3 = pneg %p2075_p13 }
  0x3e   : > { %s2069_s17 = scalar_lea.hbm %s2383_s0, %s1341_s14  ;;  %s1745_s10 = scalar_lea.hbm %s2383_s0, 2048 }
  0x3f   : > { %s1740_s15 = scalar_lea.hbm %s2069_s17, 1024  ;;  %p1746_p9 = scmp.lt.u32.totalorder %s2069_s17, %s2383_s0 }
  0x40   : > { %p1741_p0 = scmp.ne.s32.totalorder %s2069_s17, %s1740_s15  ;;  %p1747_p1 = scmp.lt.u32.totalorder %s1745_s10, %s1740_s15 }
  0x41   : > { %p1749_p4 = scmp.lt.u32.totalorder %s1740_s15, %s2069_s17 }
  0x42   : > { %p1743_p5 = pnand %p1742_p3, %p1741_p0  ;;  %p1748_p2 = por %p1747_p1, %p1746_p9 }
  0x44   : > { %p1744_p7 = pneg %p1743_p5  ;;  %p1750_p6 = por %p1749_p4, %p1748_p2 }
  0x46   : > { %p1751_p8 = pnand %p1750_p6, %p1744_p7 }
  0x48   : > { %1754 = shalt.err (!%p1751_p8)
}
  0x49   : > { %s1755_s30 = scalar_lea.vmem %s2071_s8, 1024  ;;  %s1921_s12 = smov [#allocation2]  }
  0x4a   : > { %p1756_p12 = scmp.ne.s32.totalorder %s2071_s8, %s1755_s30  ;;  %s1760_s14 = sshll.u32 %s1921_s12, 4  ;;  %s1761_s14 = int_to_ptr.vmem [resolvable:$false] %s1760_s14 }
  0x4b   : > { %s1762_s16 = scalar_lea.vmem %s1761_s14, 2048  ;;  %p1763_p5 = scmp.lt.s32.totalorder %s2071_s8, %s1761_s14 }
  0x4c   : > { %p1758_p11 = pnand %p1756_p12, %p1742_p3  ;;  %p1764_p9 = scmp.lt.s32.totalorder %s1762_s16, %s1755_s30 }
  0x4e   : > { %p1759_p0 = pneg %p1758_p11  ;;  %p1765_p1 = por %p1764_p9, %p1763_p5 }
  0x50   : > { %p1766_p2 = pnand %p1765_p1, %p1759_p0 }
  0x52   : > { %1769 = shalt.err (!%p1766_p2)
}
  0x53   : > { %s1922_s15 = smov 64   ;;  %s1923_s10 = smov 4  }
  0x54   : > { %1601 = dma.hbm_to_vmem [thread:$0]  (!%p2075_p13), %s2069_s17, 1024, %s2071_s8, %s2079_s9, %s1922_s15, %s1922_s15, %s1923_s10  }
  0x55   : > { %p2385_p3 = scmp.ne.s32.totalorder %s2377_s28, 0 }
  0x56   : > { %s2110_s29 = sand.u32 (!%p2385_p3), 1, %s1900_s19   ;;  %p2386_p7 = scmp.ne.s32.totalorder (!%p2385_p3), %s2375_s26, 0 }
  0x57   : > { %251 = sbr.rel (%p2385_p3) target bundleno = 467 (0x1d3), region = 32  ;;  %s2113_s30 = sshll.u32 (!%p2385_p3), %s2110_s29, 6 }
  0x58   : > { %s254_s12 = scalar_lea.sflag (!%p2385_p3), [#allocation3], %s2110_s29  ;;  %s2117_s14 = scalar_lea.vmem (!%p2385_p3), [#allocation2], %s2113_s30 }
  0x5e   : > { %1879 = dma.done.wait (%p2386_p7), %s254_s12, 1024  }
  0x5f   : > { %1881 = vsyncadd (%p2386_p7), %s254_s12, 4294966272  ;;  %p2387_p13 = scmp.eq.s32.totalorder %s1991_s24, 0 }
  0x61   : > { %1883 = dma.done.wait (%p2387_p13), [#allocation6], 3072   ;;  %p2388_p4 = pmov %p2387_p13 }
  0x62   : > { %v1924_v0 = vmov 0   ;;  %v1672_v1 = vld [vmem:[#allocation5 + $0x4] ss:$12 sps:$4 sm:$0xff]   ;;  %v1674_v2 = vld [vmem:[#allocation5] ss:$12 sps:$4 sm:$0xff]   ;;  %v1706_v28 = vld [vmem:[%s2117_s14 + $0x18] sm:$0xff]   ;;  %v353_v33 = vlaneseq }
  0x63   : > { %1885 = vsyncadd (%p2388_p4), [#allocation6], 4294964224  ;;  %576 = vmatprep.mubr.bf16.mxu0 %v1924_v0  ;;  %544 = vmatprep.subr.bf16.mxu0 %v1672_v1  ;;  %v1675_v3 = vld [vmem:[#allocation5 + $0x1c] ss:$12 sps:$4 sm:$0xff]   ;;  %v1677_v4 = vld [vmem:[#allocation5 + $0x18] ss:$12 sps:$4 sm:$0xff]  }
  0x64   : > { %545 = vmatpush1.bf16.msra.mxu0 %v1674_v2  ;;  %v1678_v5 = vld [vmem:[#allocation5 + $0x34] ss:$12 sps:$4 sm:$0xff]   ;;  %v1680_v6 = vld [vmem:[#allocation5 + $0x30] ss:$12 sps:$4 sm:$0xff]   ;;  %v1681_v7 = vld [vmem:[#allocation5 + $0x4c] ss:$12 sps:$4 sm:$0xff]  }
  0x65   : > { %546 = vmatprep.subr.bf16.mxu0 %v1675_v3  ;;  %v1683_v8 = vld [vmem:[#allocation5 + $0x48] ss:$12 sps:$4 sm:$0xff]   ;;  %v1684_v9 = vld [vmem:[#allocation5 + $0x64] ss:$12 sps:$4 sm:$0xff]   ;;  %v1698_v12 = vld [vmem:[#allocation5 + $0x20] ss:$12 sps:$4 sm:$0xff]  }
  0x66   : > { %v1696_v10 = vld [vmem:[#allocation5 + $0x8] ss:$12 sps:$4 sm:$0xff]   ;;  %v1697_v11 = vld [vmem:[%s2117_s14] sm:$0xff]   ;;  %v1701_v17 = vld [vmem:[#allocation5 + $0x50] ss:$12 sps:$4 sm:$0xff]   ;;  %v354_v34 = vshrl.u32 %v353_v33, 7 }
  0x67   : > { %1550 = vmatprep.subr.bf16.mxu1 %v1696_v10  ;;  %v1686_v13 = vld [vmem:[#allocation5 + $0x60] ss:$12 sps:$4 sm:$0xff]   ;;  %1566 = vmatprep.mubr.bf16.mxu1 %v1697_v11  ;;  %v1699_v14 = vld [vmem:[#allocation5 + $0x38] ss:$12 sps:$4 sm:$0xff]   ;;  %v1687_v15 = vld [vmem:[#allocation5 + $0x7c] ss:$12 sps:$4 sm:$0xff]  }
  0x68   : > { %547 = vmatpush1.bf16.msra.mxu0 %v1677_v4  ;;  %1551 = vmatpush3.bf16.msra.mxu1 %v1696_v10  ;;  %v1689_v16 = vld [vmem:[#allocation5 + $0x78] ss:$12 sps:$4 sm:$0xff]   ;;  %v1690_v18 = vld [vmem:[#allocation5 + $0x94] ss:$12 sps:$4 sm:$0xff]   ;;  %v1692_v19 = vld [vmem:[#allocation5 + $0x90] ss:$12 sps:$4 sm:$0xff]  }
  0x69   : > { %548 = vmatprep.subr.bf16.mxu0 %v1678_v5  ;;  %1552 = vmatprep.subr.bf16.mxu1 %v1698_v12  ;;  %v1702_v20 = vld [vmem:[#allocation5 + $0x68] ss:$12 sps:$4 sm:$0xff]   ;;  %v1693_v21 = vld [vmem:[#allocation5 + $0xac] ss:$12 sps:$4 sm:$0xff]   ;;  %v1707_v25 = vld [vmem:[#allocation5 + $0xb0] ss:$12 sps:$4 sm:$0xff]  }
  0x6a   : > { %v1695_v22 = vld [vmem:[#allocation5 + $0xa8] ss:$12 sps:$4 sm:$0xff]   ;;  %v1704_v23 = vld [vmem:[#allocation5 + $0x80] ss:$12 sps:$4 sm:$0xff]   ;;  %v1705_v24 = vld [vmem:[#allocation5 + $0x98] ss:$12 sps:$4 sm:$0xff]  }
  0x6b   : > { %v1700_v26 = vld [vmem:[%s2117_s14 + $0x8] sm:$0xff]   ;;  %v1703_v27 = vld [vmem:[%s2117_s14 + $0x10] sm:$0xff]   ;;  %v1708_v29 = vld [vmem:[%s2117_s14 + $0x20] sm:$0xff]   ;;  %v355_v35 = vsub.s32 0, %v354_v34  ;;  %v359_v37 = vsub.s32 1, %v354_v34  ;;  %v363_v48 = vsub.s32 2, %v354_v34 }
  0x6c   : > { %549 = vmatpush1.bf16.msra.mxu0 %v1680_v6  ;;  %1553 = vmatpush3.bf16.msra.mxu1 %v1698_v12  ;;  %v1709_v30 = vld [vmem:[%s2117_s14 + $0x28] sm:$0xff]   ;;  %v1710_v31 = vld [vmem:[%s2117_s14 + $0x30] sm:$0xff]   ;;  %v1711_v32 = vld [vmem:[%s2117_s14 + $0x38] sm:$0xff]   ;;  %s2155_s17 = scalar_lea.vmem [#allocation8], %s2113_s30  ;;  %s2161_s8 = scalar_lea.vmem [#allocation7], %s2113_s30 }
  0x6d   : > { %550 = vmatprep.subr.bf16.mxu0 %v1681_v7  ;;  %1554 = vmatprep.subr.bf16.mxu1 %v1699_v14  ;;  %v351_v36 = vld [vmem:[%s2365_s2] sm:$0x7]  ;;  %s2176_s6 = scalar_lea.vmem [#allocation10], %s2113_s30  ;;  %s1036_s9 = sshll.u32 %s2161_s8, 4  ;;  %s2231_s9 = int_to_ptr.vmem [resolvable:$true] %s1036_s9 }
  0x6e   : > { %v2146_v38 = vrot.slane %v351_v36, %v355_v35  ;;  %v2148_v40 = vrot.slane %v351_v36, %v359_v37  ;;  %v2158_v54 = vrot.slane %v351_v36, %v363_v48  ;;  %s1054_s16 = sshll.u32 %s2155_s17, 4  ;;  %s1015_s15 = sand.u32 1, %s1991_s24   ;;  %s2235_s16 = int_to_ptr.vmem [resolvable:$true] %s1054_s16 }
  0x6f   : > { %s1390_s10 = sshll.u32 %s1908_s21, 10  ;;  %s1072_s30 = sshll.u32 %s2176_s6, 4  ;;  %s2250_s30 = int_to_ptr.vmem [resolvable:$true] %s1072_s30 }
  0x70   : > { %551 = vmatpush1.bf16.msra.mxu0 %v1683_v8  ;;  %1555 = vmatpush3.bf16.msra.mxu1 %v1699_v14  ;;  %s2243_s14 = scalar_lea.hbm %s2367_s4, %s1390_s10  ;;  %s2248_s28 = scalar_lea.hbm %s2366_s3, %s1390_s10 }
  0x71   : > { %552 = vmatprep.subr.bf16.mxu0 %v1684_v9  ;;  %1556 = vmatprep.subr.bf16.mxu1 %v1701_v17  ;;  %s2256_s0 = scalar_lea.hbm %s2368_s5, %s1390_s10  ;;  %s2259_s1 = scalar_lea.sflag [#allocation9], %s1015_s15 }
  0x72   : > { %s1770_s24 = scalar_lea.vmem %s2235_s16, 1024  ;;  %s1925_s12 = smov [#allocation8]  }
  0x73   : > { %p1771_p6 = scmp.ne.s32.totalorder %s2235_s16, %s1770_s24  ;;  %s1774_s21 = sshll.u32 %s1925_s12, 4  ;;  %s1775_s21 = int_to_ptr.vmem [resolvable:$false] %s1774_s21 }
  0x74   : > { %553 = vmatpush1.bf16.msra.mxu0 %v1686_v13  ;;  %1557 = vmatpush3.bf16.msra.mxu1 %v1701_v17  ;;  %s1776_s26 = scalar_lea.vmem %s1775_s21, 2048  ;;  %p1777_p11 = scmp.lt.s32.totalorder %s2235_s16, %s1775_s21 }
  0x75   : > { %554 = vmatprep.subr.bf16.mxu0 %v1687_v15  ;;  %1558 = vmatprep.subr.bf16.mxu1 %v1702_v20  ;;  %p1772_p8 = pnand %p1771_p6, %p2054_p10  ;;  %p1778_p0 = scmp.lt.s32.totalorder %s1776_s26, %s1770_s24 }
  0x77   : > { %p1773_p12 = pneg %p1772_p8  ;;  %p1779_p5 = por %p1778_p0, %p1777_p11 }
  0x78   : > { %555 = vmatpush1.bf16.msra.mxu0 %v1689_v16  ;;  %1559 = vmatpush3.bf16.msra.mxu1 %v1702_v20 }
  0x79   : > { %556 = vmatprep.subr.bf16.mxu0 %v1690_v18  ;;  %1560 = vmatprep.subr.bf16.mxu1 %v1704_v23  ;;  %p1780_p9 = pnand %p1779_p5, %p1773_p12 }
  0x7c   : > { %557 = vmatpush1.bf16.msra.mxu0 %v1692_v19  ;;  %1561 = vmatpush3.bf16.msra.mxu1 %v1704_v23 }
  0x7d   : > { %558 = vmatprep.subr.bf16.mxu0 %v1693_v21  ;;  %1562 = vmatprep.subr.bf16.mxu1 %v1705_v24 }
  0x80   : > { %559 = vmatpush1.bf16.msra.mxu0 %v1695_v22  ;;  %1563 = vmatpush3.bf16.msra.mxu1 %v1705_v24 }
  0x81   : > { %1564 = vmatprep.subr.bf16.mxu1 %v1707_v25 }
  0x83   : > { %577 = vmatmul.mubr.bf16.vlgmr.msra.gmra.mrb[0].mxu0 %v1697_v11 }
  0x84   : > { %586 = vmatprep.mubr.bf16.mxu0 %v1924_v0  ;;  %1565 = vmatpush3.bf16.msra.mxu1 %v1707_v25 }
  0x87   : > { %1567 = vmatmul.mubr.bf16.vlgmr.msra.gmra.mrb[0].mxu1 %v1700_v26 }
  0x88   : > { %1570 = vmatprep.mubr.bf16.mxu1 %v1703_v27 }
  0x8b   : > { %587 = vmatmul.mubr.bf16.gmra.mrb[4].mxu0 %v1700_v26 }
  0x8c   : > { %596 = vmatprep.mubr.bf16.mxu0 %v1924_v0 }
  0x8f   : > { %1571 = vmatmul.mubr.bf16.gmra.mrb[4].mxu1 %v1706_v28 }
  0x90   : > { %1574 = vmatprep.mubr.bf16.mxu1 %v1708_v29 }
  0x93   : > { %597 = vmatmul.mubr.bf16.gmra.mrb[8].mxu0 %v1703_v27 }
  0x94   : > { %606 = vmatprep.mubr.bf16.mxu0 %v1924_v0 }
  0x97   : > { %1575 = vmatmul.mubr.bf16.gmra.mrb[8].mxu1 %v1709_v30 }
  0x98   : > { %1578 = vmatprep.mubr.bf16.mxu1 %v1710_v31 }
  0x9b   : > { %607 = vmatmul.mubr.bf16.gmra.mrb[12].mxu0 %v1706_v28 }
  0x9c   : > { %616 = vmatprep.mubr.bf16.mxu0 %v1924_v0 }
  0x9f   : > { %1579 = vmatmul.mubr.bf16.gmra.mrb[12].mxu1 %v1711_v32 }
  0xa3   : > { %617 = vmatmul.mubr.bf16.gmra.mrb[16].mxu0 %v1708_v29 }
  0xa4   : > { %626 = vmatprep.mubr.bf16.mxu0 %v1924_v0 }
  0xab   : > { %627 = vmatmul.mubr.bf16.gmra.mrb[20].mxu0 %v1709_v30 }
  0xac   : > { %636 = vmatprep.mubr.bf16.mxu0 %v1924_v0 }
  0xb3   : > { %637 = vmatmul.mubr.bf16.gmra.mrb[24].mxu0 %v1710_v31 }
  0xb4   : > { %646 = vmatprep.mubr.bf16.mxu0 %v1924_v0 }
  0xbb   : > { %647 = vmatmul.mubr.bf16.gmra.mrb[28].mxu0 %v1711_v32 }
 0x156   : > { %v578_v39 = vpop.f32.mrb[0].mxu0 }
 0x157   : > { %v579_v41 = vadd.f32 %v578_v39, %v2146_v38  ;;  %v580_v42 = vpop.f32.mrb[1].mxu0 }
 0x158   : > { %v582_v43 = vpop.f32.mrb[2].mxu0  ;;  %v581_v46 = vadd.f32 %v580_v42, %v2148_v40 }
 0x159   : > { %v583_v44 = vadd.f32 %v582_v43, %v2146_v38  ;;  %v584_v45 = vpop.f32.mrb[3].mxu0  ;;  %v754_v49 = vmul.f32 0.17677669, %v579_v41 }
 0x15a   : > { %v585_v47 = vadd.f32 %v584_v45, %v2148_v40  ;;  %v1568_v60 = vpop.f32.mrb[0].mxu1 }
 0x15b   : > { %v755_v50 = vmul.f32 0.17677669, %v583_v44  ;;  %v700_v63 = vadd.f32 %v1568_v60, %v2158_v54  ;;  %v691_v0 = vpop.f32.mrb[1].mxu1 }
 0x15c   : > { %v1436_v51 = vpack.c.bf16 %v585_v47, %v581_v46  ;;  %v692_v3 = vadd.f32 %v691_v0, %v2158_v54  ;;  %v1569_v4 = vpop.f32.mrb[2].mxu1 }
 0x15d   : > { %v1396_v52 = vpack.c.bf16 %v755_v50, %v754_v49  ;;  %v703_v6 = vadd.f32 %v1569_v4, %v2158_v54  ;;  %v694_v7 = vpop.f32.mrb[3].mxu1 }
 0x15e   : > { %1437 = vst [vmem:[%s2155_s17] sm:$0xff] %v1436_v51   ;;  %v588_v53 = vpop.f32.mrb[4].mxu0  ;;  %v695_v9 = vadd.f32 %v694_v7, %v2158_v54 }
 0x15f   : > { %1397 = vst [vmem:[%s2161_s8] sm:$0xff] %v1396_v52   ;;  %v589_v55 = vadd.f32 %v588_v53, %v2146_v38  ;;  %v590_v56 = vpop.f32.mrb[5].mxu0  ;;  %v1481_v11 = vpack.c.bf16 %v703_v6, %v700_v63 }
 0x160   : > { %v592_v57 = vpop.f32.mrb[6].mxu0  ;;  %v591_v61 = vadd.f32 %v590_v56, %v2148_v40  ;;  %v1476_v14 = vpack.c.bf16 %v695_v9, %v692_v3 }
 0x161   : > { %v593_v58 = vadd.f32 %v592_v57, %v2146_v38  ;;  %v594_v59 = vpop.f32.mrb[7].mxu0  ;;  %v756_v1 = vmul.f32 0.17677669, %v589_v55  ;;  %1527 = vst [vmem:[%s2176_s6 + $0x8] sm:$0xff] %v1481_v11  }
 0x162   : > { %v595_v62 = vadd.f32 %v594_v59, %v2148_v40  ;;  %1477 = vst [vmem:[%s2176_s6] sm:$0xff] %v1476_v14   ;;  %v1572_v18 = vpop.f32.mrb[4].mxu1 }
 0x163   : > { %v757_v2 = vmul.f32 0.17677669, %v593_v58  ;;  %v716_v21 = vadd.f32 %v1572_v18, %v2158_v54  ;;  %v707_v22 = vpop.f32.mrb[5].mxu1 }
 0x164   : > { %v1441_v5 = vpack.c.bf16 %v595_v62, %v591_v61  ;;  %v708_v25 = vadd.f32 %v707_v22, %v2158_v54  ;;  %v1573_v26 = vpop.f32.mrb[6].mxu1 }
 0x165   : > { %v1401_v8 = vpack.c.bf16 %v757_v2, %v756_v1  ;;  %v719_v28 = vadd.f32 %v1573_v26, %v2158_v54  ;;  %v710_v29 = vpop.f32.mrb[7].mxu1 }
 0x166   : > { %1520 = vst [vmem:[%s2155_s17 + $0x8] sm:$0xff] %v1441_v5   ;;  %v598_v10 = vpop.f32.mrb[8].mxu0  ;;  %v711_v31 = vadd.f32 %v710_v29, %v2158_v54 }
 0x167   : > { %1513 = vst [vmem:[%s2161_s8 + $0x8] sm:$0xff] %v1401_v8   ;;  %v599_v12 = vadd.f32 %v598_v10, %v2146_v38  ;;  %v600_v13 = vpop.f32.mrb[9].mxu0  ;;  %v1491_v33 = vpack.c.bf16 %v719_v28, %v716_v21 }
 0x168   : > { %v602_v15 = vpop.f32.mrb[10].mxu0  ;;  %v601_v19 = vadd.f32 %v600_v13, %v2148_v40  ;;  %v1486_v36 = vpack.c.bf16 %v711_v31, %v708_v25 }
 0x169   : > { %v603_v16 = vadd.f32 %v602_v15, %v2146_v38  ;;  %v604_v17 = vpop.f32.mrb[11].mxu0  ;;  %v758_v23 = vmul.f32 0.17677669, %v599_v12  ;;  %1529 = vst [vmem:[%s2176_s6 + $0x18] sm:$0xff] %v1491_v33  }
 0x16a   : > { %v605_v20 = vadd.f32 %v604_v17, %v2148_v40  ;;  %1528 = vst [vmem:[%s2176_s6 + $0x10] sm:$0xff] %v1486_v36   ;;  %v1576_v42 = vpop.f32.mrb[8].mxu1 }
 0x16b   : > { %v759_v24 = vmul.f32 0.17677669, %v603_v16  ;;  %v732_v45 = vadd.f32 %v1576_v42, %v2158_v54  ;;  %v723_v46 = vpop.f32.mrb[9].mxu1 }
 0x16c   : > { %v1446_v27 = vpack.c.bf16 %v605_v20, %v601_v19  ;;  %v724_v49 = vadd.f32 %v723_v46, %v2158_v54  ;;  %v1577_v50 = vpop.f32.mrb[10].mxu1 }
 0x16d   : > { %v1406_v30 = vpack.c.bf16 %v759_v24, %v758_v23  ;;  %v735_v52 = vadd.f32 %v1577_v50, %v2158_v54  ;;  %v726_v53 = vpop.f32.mrb[11].mxu1 }
 0x16e   : > { %1521 = vst [vmem:[%s2155_s17 + $0x10] sm:$0xff] %v1446_v27   ;;  %v608_v32 = vpop.f32.mrb[12].mxu0  ;;  %v727_v56 = vadd.f32 %v726_v53, %v2158_v54 }
 0x16f   : > { %1514 = vst [vmem:[%s2161_s8 + $0x10] sm:$0xff] %v1406_v30   ;;  %v609_v34 = vadd.f32 %v608_v32, %v2146_v38  ;;  %v610_v35 = vpop.f32.mrb[13].mxu0  ;;  %v1501_v58 = vpack.c.bf16 %v735_v52, %v732_v45 }
 0x170   : > { %v612_v37 = vpop.f32.mrb[14].mxu0  ;;  %v611_v43 = vadd.f32 %v610_v35, %v2148_v40  ;;  %v1496_v61 = vpack.c.bf16 %v727_v56, %v724_v49 }
 0x171   : > { %v613_v39 = vadd.f32 %v612_v37, %v2146_v38  ;;  %v614_v41 = vpop.f32.mrb[15].mxu0  ;;  %v760_v47 = vmul.f32 0.17677669, %v609_v34  ;;  %1531 = vst [vmem:[%s2176_s6 + $0x28] sm:$0xff] %v1501_v58  }
 0x172   : > { %v615_v44 = vadd.f32 %v614_v41, %v2148_v40  ;;  %1530 = vst [vmem:[%s2176_s6 + $0x20] sm:$0xff] %v1496_v61   ;;  %v1580_v1 = vpop.f32.mrb[12].mxu1 }
 0x173   : > { %v761_v48 = vmul.f32 0.17677669, %v613_v39  ;;  %v748_v4 = vadd.f32 %v1580_v1, %v2158_v54  ;;  %v739_v5 = vpop.f32.mrb[13].mxu1 }
 0x174   : > { %v1451_v51 = vpack.c.bf16 %v615_v44, %v611_v43  ;;  %v740_v8 = vadd.f32 %v739_v5, %v2158_v54  ;;  %v1581_v9 = vpop.f32.mrb[14].mxu1 }
 0x175   : > { %v1411_v55 = vpack.c.bf16 %v761_v48, %v760_v47  ;;  %v751_v11 = vadd.f32 %v1581_v9, %v2158_v54  ;;  %v742_v12 = vpop.f32.mrb[15].mxu1 }
 0x176   : > { %1522 = vst [vmem:[%s2155_s17 + $0x18] sm:$0xff] %v1451_v51   ;;  %v618_v57 = vpop.f32.mrb[16].mxu0  ;;  %v743_v14 = vadd.f32 %v742_v12, %v2158_v54 }
 0x177   : > { %1515 = vst [vmem:[%s2161_s8 + $0x18] sm:$0xff] %v1411_v55   ;;  %v619_v59 = vadd.f32 %v618_v57, %v2146_v38  ;;  %v620_v60 = vpop.f32.mrb[17].mxu0  ;;  %v1511_v16 = vpack.c.bf16 %v751_v11, %v748_v4 }
 0x178   : > { %v622_v62 = vpop.f32.mrb[18].mxu0  ;;  %v621_v2 = vadd.f32 %v620_v60, %v2148_v40  ;;  %v1506_v19 = vpack.c.bf16 %v743_v14, %v740_v8 }
 0x179   : > { %v623_v63 = vadd.f32 %v622_v62, %v2146_v38  ;;  %v624_v0 = vpop.f32.mrb[19].mxu0  ;;  %v762_v6 = vmul.f32 0.17677669, %v619_v59  ;;  %1533 = vst [vmem:[%s2176_s6 + $0x38] sm:$0xff] %v1511_v16  }
 0x17a   : > { %v625_v3 = vadd.f32 %v624_v0, %v2148_v40  ;;  %1532 = vst [vmem:[%s2176_s6 + $0x30] sm:$0xff] %v1506_v19  }
 0x17b   : > { %v763_v7 = vmul.f32 0.17677669, %v623_v63 }
 0x17c   : > { %v1456_v10 = vpack.c.bf16 %v625_v3, %v621_v2 }
 0x17d   : > { %v1416_v13 = vpack.c.bf16 %v763_v7, %v762_v6 }
 0x17e   : > { %1523 = vst [vmem:[%s2155_s17 + $0x20] sm:$0xff] %v1456_v10   ;;  %v628_v15 = vpop.f32.mrb[20].mxu0 }
 0x17f   : > { %1516 = vst [vmem:[%s2161_s8 + $0x20] sm:$0xff] %v1416_v13   ;;  %v629_v17 = vadd.f32 %v628_v15, %v2146_v38  ;;  %v630_v18 = vpop.f32.mrb[21].mxu0 }
 0x180   : > { %v632_v20 = vpop.f32.mrb[22].mxu0  ;;  %v631_v23 = vadd.f32 %v630_v18, %v2148_v40 }
 0x181   : > { %v633_v21 = vadd.f32 %v632_v20, %v2146_v38  ;;  %v634_v22 = vpop.f32.mrb[23].mxu0  ;;  %v764_v24 = vmul.f32 0.17677669, %v629_v17 }
 0x182   : > { %v635_v54 = vadd.f32 %v634_v22, %v2148_v40 }
 0x183   : > { %v765_v25 = vmul.f32 0.17677669, %v633_v21 }
 0x184   : > { %v1461_v26 = vpack.c.bf16 %v635_v54, %v631_v23 }
 0x185   : > { %v1421_v27 = vpack.c.bf16 %v765_v25, %v764_v24 }
 0x186   : > { %1524 = vst [vmem:[%s2155_s17 + $0x28] sm:$0xff] %v1461_v26   ;;  %v638_v28 = vpop.f32.mrb[24].mxu0 }
 0x187   : > { %1517 = vst [vmem:[%s2161_s8 + $0x28] sm:$0xff] %v1421_v27   ;;  %v639_v29 = vadd.f32 %v638_v28, %v2146_v38  ;;  %v640_v30 = vpop.f32.mrb[25].mxu0 }
 0x188   : > { %v642_v31 = vpop.f32.mrb[26].mxu0  ;;  %v641_v34 = vadd.f32 %v640_v30, %v2148_v40 }
 0x189   : > { %v643_v32 = vadd.f32 %v642_v31, %v2146_v38  ;;  %v644_v33 = vpop.f32.mrb[27].mxu0  ;;  %v766_v36 = vmul.f32 0.17677669, %v639_v29 }
 0x18a   : > { %v645_v35 = vadd.f32 %v644_v33, %v2148_v40 }
 0x18b   : > { %v767_v37 = vmul.f32 0.17677669, %v643_v32 }
 0x18c   : > { %v1466_v39 = vpack.c.bf16 %v645_v35, %v641_v34 }
 0x18d   : > { %v1426_v41 = vpack.c.bf16 %v767_v37, %v766_v36 }
 0x18e   : > { %1525 = vst [vmem:[%s2155_s17 + $0x30] sm:$0xff] %v1466_v39   ;;  %v648_v42 = vpop.f32.mrb[28].mxu0 }
 0x18f   : > { %1518 = vst [vmem:[%s2161_s8 + $0x30] sm:$0xff] %v1426_v41   ;;  %v649_v43 = vadd.f32 %v648_v42, %v2146_v38  ;;  %v650_v44 = vpop.f32.mrb[29].mxu0 }
 0x190   : > { %v652_v45 = vpop.f32.mrb[30].mxu0  ;;  %v651_v48 = vadd.f32 %v650_v44, %v2148_v40 }
 0x191   : > { %v653_v46 = vadd.f32 %v652_v45, %v2146_v38  ;;  %v654_v47 = vpop.f32.mrb[31].mxu0  ;;  %v768_v50 = vmul.f32 0.17677669, %v649_v43 }
 0x192   : > { %v655_v49 = vadd.f32 %v654_v47, %v2148_v40 }
 0x193   : > { %v769_v51 = vmul.f32 0.17677669, %v653_v46 }
 0x194   : > { %v1471_v52 = vpack.c.bf16 %v655_v49, %v651_v48 }
 0x195   : > { %v1431_v38 = vpack.c.bf16 %v769_v51, %v768_v50 }
 0x196   : > { %1526 = vst [vmem:[%s2155_s17 + $0x38] sm:$0xff] %v1471_v52  }
 0x197   : > { %1519 = vst [vmem:[%s2161_s8 + $0x38] sm:$0xff] %v1431_v38  }
 0x198   : > { %1783 = shalt.err (!%p1780_p9)
}
 0x199   : > { %s1784_s25 = scalar_lea.hbm %s2243_s14, 1024  ;;  %s1788_s15 = scalar_lea.hbm %s2367_s4, 2048 }
 0x19a   : > { %p1785_p1 = scmp.ne.s32.totalorder %s2243_s14, %s1784_s25  ;;  %p1789_p7 = scmp.lt.u32.totalorder %s2243_s14, %s2367_s4 }
 0x19b   : > { %p1790_p13 = scmp.lt.u32.totalorder %s1788_s15, %s1784_s25  ;;  %p1792_p6 = scmp.lt.u32.totalorder %s1784_s25, %s2243_s14 }
 0x19c   : > { %p1786_p2 = pnand %p1785_p1, %p2054_p10 }
 0x19d   : > { %p1791_p4 = por %p1790_p13, %p1789_p7 }
 0x19e   : > { %p1787_p3 = pneg %p1786_p2 }
 0x19f   : > { %p1793_p8 = por %p1792_p6, %p1791_p4 }
 0x1a1   : > { %p1794_p12 = pnand %p1793_p8, %p1787_p3 }
 0x1a3   : > { %1797 = shalt.err (!%p1794_p12)
}
 0x1a4   : > { %s1926_s24 = smov 64   ;;  %s1927_s12 = smov 4  }
 0x1a5   : > { %1589 = dma.vmem_to_hbm [thread:$0]  (%p2054_p10), %s2235_s16, 1024, %s2243_s14, %s2259_s1, %s1926_s24, %s1926_s24, %s1927_s12  }
 0x1a6   : > { %s1011_s21 = scalar_lea.sflag [#allocation4], %s2110_s29  ;;  %s1798_s26 = scalar_lea.vmem %s2231_s9, 1024 }
 0x1a7   : > { %p1799_p11 = scmp.ne.s32.totalorder %s2231_s9, %s1798_s26  ;;  %s1928_s25 = smov [#allocation7]  }
 0x1a8   : > { %s1802_s17 = sshll.u32 %s1928_s25, 4  ;;  %s1803_s17 = int_to_ptr.vmem [resolvable:$false] %s1802_s17 }
 0x1a9   : > { %p1800_p0 = pnand %p1799_p11, %p2054_p10  ;;  %s1804_s8 = scalar_lea.vmem %s1803_s17, 2048 }
 0x1aa   : > { %p1805_p9 = scmp.lt.s32.totalorder %s2231_s9, %s1803_s17  ;;  %p1806_p1 = scmp.lt.s32.totalorder %s1804_s8, %s1798_s26 }
 0x1ab   : > { %p1801_p5 = pneg %p1800_p0 }
 0x1ac   : > { %p1807_p2 = por %p1806_p1, %p1805_p9 }
 0x1ae   : > { %p1808_p3 = pnand %p1807_p2, %p1801_p5 }
 0x1b0   : > { %1811 = shalt.err (!%p1808_p3)
}
 0x1b1   : > { %s1812_s16 = scalar_lea.hbm %s2248_s28, 1024  ;;  %s1816_s10 = scalar_lea.hbm %s2366_s3, 2048 }
 0x1b2   : > { %p1813_p7 = scmp.ne.s32.totalorder %s2248_s28, %s1812_s16  ;;  %p1817_p6 = scmp.lt.u32.totalorder %s2248_s28, %s2366_s3 }
 0x1b3   : > { %p1818_p8 = scmp.lt.u32.totalorder %s1816_s10, %s1812_s16  ;;  %p1820_p11 = scmp.lt.u32.totalorder %s1812_s16, %s2248_s28 }
 0x1b4   : > { %p1814_p13 = pnand %p1813_p7, %p2054_p10 }
 0x1b5   : > { %p1819_p12 = por %p1818_p8, %p1817_p6 }
 0x1b6   : > { %p1815_p4 = pneg %p1814_p13 }
 0x1b7   : > { %p1821_p0 = por %p1820_p11, %p1819_p12 }
 0x1b9   : > { %p1822_p5 = pnand %p1821_p0, %p1815_p4 }
 0x1bb   : > { %1825 = shalt.err (!%p1822_p5)
}
 0x1bc   : > { %1588 = dma.vmem_to_hbm [thread:$0]  (%p2054_p10), %s2231_s9, 1024, %s2248_s28, %s1011_s21, %s1926_s24, %s1926_s24, %s1927_s12  }
 0x1bd   : > { %s1826_s26 = scalar_lea.vmem %s2250_s30, 1024  ;;  %s1929_s17 = smov [#allocation10]  }
 0x1be   : > { %p1827_p9 = scmp.ne.s32.totalorder %s2250_s30, %s1826_s26  ;;  %s1830_s8 = sshll.u32 %s1929_s17, 4  ;;  %s1831_s8 = int_to_ptr.vmem [resolvable:$false] %s1830_s8 }
 0x1bf   : > { %s1832_s16 = scalar_lea.vmem %s1831_s8, 2048  ;;  %p1833_p3 = scmp.lt.s32.totalorder %s2250_s30, %s1831_s8 }
 0x1c0   : > { %p1828_p1 = pnand %p1827_p9, %p2054_p10  ;;  %p1834_p7 = scmp.lt.s32.totalorder %s1832_s16, %s1826_s26 }
 0x1c2   : > { %p1829_p2 = pneg %p1828_p1  ;;  %p1835_p13 = por %p1834_p7, %p1833_p3 }
 0x1c4   : > { %p1836_p4 = pnand %p1835_p13, %p1829_p2 }
 0x1c6   : > { %1839 = shalt.err (!%p1836_p4)
}
 0x1c7   : > { %s1840_s29 = scalar_lea.hbm %s2256_s0, 1024  ;;  %s1844_s21 = scalar_lea.hbm %s2368_s5, 2048 }
 0x1c8   : > { %p1841_p6 = scmp.ne.s32.totalorder %s2256_s0, %s1840_s29  ;;  %p1845_p11 = scmp.lt.u32.totalorder %s2256_s0, %s2368_s5 }
 0x1c9   : > { %p1846_p0 = scmp.lt.u32.totalorder %s1844_s21, %s1840_s29  ;;  %p1848_p9 = scmp.lt.u32.totalorder %s1840_s29, %s2256_s0 }
 0x1ca   : > { %p1842_p8 = pnand %p1841_p6, %p2054_p10 }
 0x1cb   : > { %p1847_p5 = por %p1846_p0, %p1845_p11 }
 0x1cc   : > { %p1843_p12 = pneg %p1842_p8 }
 0x1cd   : > { %p1849_p1 = por %p1848_p9, %p1847_p5 }
 0x1cf   : > { %p1850_p2 = pnand %p1849_p1, %p1843_p12 }
 0x1d1   : > { %1853 = shalt.err (!%p1850_p2)
}
 0x1d2   : > { %1590 = dma.vmem_to_hbm [thread:$0]  (%p2054_p10), %s2250_s30, 1024, %s2256_s0, %s2259_s1, %s1926_s24, %s1926_s24, %s1927_s12  }
 0x1d3 PF: > { %s1087_s10 = sand.u32 1, %s1896_s18   ;;  %p2389_p3 = scmp.ne.s32.totalorder %s2376_s27, 0 }
 0x1d4   : > { %p2390_p7 = scmp.ge.s32.totalorder %s1916_s23, 2  ;;  %s1088_s6 = scalar_lea.sflag [#allocation4], %s1087_s10 }
 0x1d6   : > { %p1603_p13 = pnand %p2390_p7, %p2389_p3 }
 0x1d8   : > { %1887 = dma.done.wait (!%p1603_p13), %s1088_s6, 1024  }
 0x1d9   : > { %1889 = vsyncadd (!%p1603_p13), %s1088_s6, 4294966272  ;;  %s2391_s11 = sadd.s32 4294967294, %s1916_s23  }
 0x1da   : > { %s1096_s25 = sand.u32 1, %s2391_s11  }
 0x1db   : > { %s1097_s26 = scalar_lea.sflag [#allocation9], %s1096_s25 }
 0x1dc   : > { %1891 = dma.done.wait (!%p1603_p13), %s1097_s26, 2048  }
 0x1dd   : > { %1893 = vsyncadd (!%p1603_p13), %s1097_s26, 4294965248  ;;  %s26_s23 = sadd.s32 1, %s1916_s23   ;;  %s2392_s18 = smov %s1900_s19 }
 0x1de   : > { %p23_p10 = scmp.ge.s32.totalorder %s26_s23, 4   ;;  %s2393_s19 = smov %s1904_s20 }
 0x1df   : > { %s2394_s20 = smov %s2063_s13  ;;  %s2395_s21 = smov %s1912_s22 }
 0x1e0   : > { %s2396_s22 = smov %s2398_s7  ;;  %25 = sbr.rel (!%p23_p10) target bundleno = 12 (0xc), region = 113 }
 0x1e7   :  { %1111 = vsyncpa [#allocation3], 1 }
 0x1e8   :  { %1113 = vsyncpa [#allocation3 + $0x1], 1 }
 0x1e9   :  { %1114 = vsyncpa [#allocation6], 1 }
 0x1ea   :  { %1115 = vsyncpa [#allocation4], 1 }
 0x1eb   :  { %1117 = vsyncpa [#allocation4 + $0x1], 1 }
 0x1ec   :  { %1118 = vsyncpa [#allocation9], 1 }
 0x1ed   :  { %1120 = vsyncpa [#allocation9 + $0x1], 1 }

// kernel: tpu_custom_call.1
= control target key start
LH: loop header
LB: loop body
LE: loop exit
PB: predicated region body
PF: predicated region fallthrough
CT: control target
= control target key end

     0   :  { %s2363_s0 = inlined_call_operand.hbm [shape: bf16[2,128,128], index: 0, kind: input, shape index: {}]   ;;  %s2364_s1 = inlined_call_operand.hbm [shape: bf16[128,384], index: 1, kind: input, shape index: {}]   ;;  %s2365_s2 = inlined_call_operand.vmem [shape: f32[1,384], index: 2, kind: input, shape index: {}]   ;;  %s2366_s3 = inlined_call_operand.hbm [shape: bf16[2,128,128], index: 3, kind: output, shape index: {0}]   ;;  %s2367_s4 = inlined_call_operand.hbm [shape: bf16[2,128,128], index: 4, kind: output, shape index: {1}]   ;;  %s2368_s5 = inlined_call_operand.hbm [shape: bf16[2,128,128], index: 5, kind: output, shape index: {2}]  }
   0x1   :  { %2373 = sst [smem:[#allocation15_spill]] %s2363_s0 }
   0x2   :  { %2374 = sst [smem:[#allocation16_spill]] %s2364_s1 }
   0x3   :  { %11 = vsyncpa [#allocation3], 0 }
   0x4   :  { %13 = vsyncpa [#allocation3 + $0x1], 0 }
   0x5   :  { %14 = vsyncpa [#allocation6], 0 }
   0x6   :  { %15 = vsyncpa [#allocation4], 0 }
   0x7   :  { %17 = vsyncpa [#allocation4 + $0x1], 0 }
   0x8   :  { %18 = vsyncpa [#allocation9], 0 }
   0x9   :  { %20 = vsyncpa [#allocation9 + $0x1], 0  ;;  %s1960_s18 = smov 0   ;;  %s1962_s19 = smov 0  }
   0xa   :  { %s1964_s20 = smov 0   ;;  %s1966_s21 = smov 0  }
   0xb   :  { %s1968_s22 = smov 0   ;;  %s1970_s23 = smov 0  }
   0xc LB: > { %s1991_s24 = sadd.s32 4294967295, %s1916_s23   ;;  %s2372_s25 = sadd.s32 4294967294, %s1916_s23   ;;  %s1916_s23 = sphi %s1970_s23, %s26_s23   ;;  %s1912_s22 = sphi %s1968_s22, %s2396_s22   ;;  %s1908_s21 = sphi %s1966_s21, %s2395_s21   ;;  %s1904_s20 = sphi %s1964_s20, %s2394_s20   ;;  %s1900_s19 = sphi %s1962_s19, %s2393_s19   ;;  %s1896_s18 = sphi %s1960_s18, %s2392_s18  }
   0xd   : > { %p60_p0 = scmp.ne.s32.totalorder %s1900_s19, %s1896_s18  ;;  %p2369_p1 = scmp.eq.s32.totalorder %s1991_s24, 0 }
   0xe   : > { %p134_p3 = scmp.eq.s32.totalorder %s2372_s25, 1  ;;  %p1238_p5 = scmp.ge.s32.totalorder %s1916_s23, 1 }
   0xf   : > { %p2002_p4 = por %p2369_p1, %p60_p0  ;;  %p197_p7 = scmp.lt.s32.totalorder %s1916_s23, 3 }
  0x10   : > { %p2007_p6 = por %p134_p3, %p60_p0  ;;  %s1918_s29 = smov [#allocation5]  }
  0x11   : > { %s2375_s26 = scalar_select %p2002_p4, 1, 0 }
  0x12   : > { %s2376_s27 = scalar_select %p2007_p6, 1, 0 }
  0x13   : > { %p2012_p8 = pnand %p1238_p5, %p197_p7  ;;  %s209_s30 = sshll.u32 %s1918_s29, 4  ;;  %s210_s30 = int_to_ptr.vmem [resolvable:$true] %s209_s30 }
  0x14   : > { %s38_s7 = sadd.s32 1, %s1912_s22  ;;  %s2379_s1 = sld [smem:[#allocation16_spill]] }
  0x15   : > { %s2377_s28 = scalar_select %p2012_p8, 1, 0 }
  0x16   : > { %p1594_p9 = pneg %p2012_p8 }
  0x18   : > { %p2021_p11 = pnand %p1594_p9, %p2369_p1 }
  0x1a   : > { %s1712_s10 = scalar_lea.hbm %s2379_s1, 3072  ;;  %p1714_p13 = pneg %p2021_p11 }
  0x1b   : > { %p1713_p12 = scmp.ne.s32.totalorder %s2379_s1, %s1712_s10  ;;  %p1719_p5 = scmp.lt.u32.totalorder %s1712_s10, %s2379_s1 }
  0x1d   : > { %p1715_p0 = pnand %p1714_p13, %p1713_p12 }
  0x1f   : > { %p1716_p3 = pneg %p1715_p0 }
  0x21   : > { %p1721_p7 = pnand %p1719_p5, %p1716_p3 }
  0x23   : > { %1724 = shalt.err (!%p1721_p7)
}
  0x24   : > { %s1725_s15 = scalar_lea.vmem %s210_s30, 3072  ;;  %p1733_p2 = scmp.lt.s32.totalorder %s210_s30, %s210_s30 }
  0x25   : > { %p1726_p9 = scmp.ne.s32.totalorder %s210_s30, %s1725_s15  ;;  %p1734_p6 = scmp.lt.s32.totalorder %s1725_s15, %s1725_s15 }
  0x27   : > { %p1728_p10 = pnand %p1726_p9, %p1714_p13  ;;  %p1735_p4 = por %p1734_p6, %p1733_p2 }
  0x29   : > { %p1729_p1 = pneg %p1728_p10 }
  0x2b   : > { %p1736_p8 = pnand %p1735_p4, %p1729_p1 }
  0x2d   : > { %1739 = shalt.err (!%p1736_p8)
}
  0x2e   : > { %s1919_s16 = smov 192   ;;  %s1920_s17 = smov 12  }
  0x2f   : > { %1597 = dma.hbm_to_vmem [thread:$0]  (!%p2021_p11), %s2379_s1, 3072, %s210_s30, [#allocation6], %s1919_s16, %s1919_s16, %s1920_s17  }
  0x30   : > { %p40_p1 = scmp.ge.s32.totalorder %s38_s7, 2  ;;  %s47_s9 = sadd.s32 1, %s1904_s20 }
  0x31   : > { %p54_p2 = scmp.ne.s32.totalorder %s1904_s20, %s1900_s19  ;;  %p55_p4 = scmp.eq.s32.totalorder %s1916_s23, 0 }
  0x32   : > { %s2398_s7 = smov (%p40_p1, %s38_s7), 0  ;;  %p2381_p8 = scmp.eq.s32.totalorder %s1991_s24, 1 }
  0x33   : > { %p2048_p6 = por %p55_p4, %p54_p2  ;;  %s42_s6 = ssub.s32 %s1912_s22, %s2398_s7 }
  0x34   : > { %p2054_p10 = por %p2381_p8, %p54_p2  ;;  %p1613_p12 = scmp.lt.s32.totalorder %s1916_s23, 2 }
  0x35   : > { %p45_p11 = scmp.eq.s32.totalorder %s42_s6, 0  ;;  %s226_s30 = sand.u32 1, %s1904_s20  }
  0x36   : > { %s1241_s12 = sshll.u32 %s226_s30, 6  ;;  %s1341_s14 = sshll.u32 %s1912_s22, 10 }
  0x37   : > { %s2063_s13 = scalar_select %p45_p11, %s1904_s20, %s47_s9  }
  0x38   : > { %s2383_s0 = sld [smem:[#allocation15_spill]]  ;;  %s230_s29 = scalar_lea.vmem [#allocation2], %s1241_s12 }
  0x39   : > { %s239_s8 = sshll.u32 %s230_s29, 4  ;;  %p2075_p13 = pnand %p1613_p12, %p2048_p6  ;;  %s2071_s8 = int_to_ptr.vmem [resolvable:$true] %s239_s8 }
  0x3a   : > { %s2079_s9 = scalar_lea.sflag [#allocation3], %s226_s30 }
  0x3b   : > { %p1742_p3 = pneg %p2075_p13 }
  0x3e   : > { %s2069_s17 = scalar_lea.hbm %s2383_s0, %s1341_s14  ;;  %s1745_s10 = scalar_lea.hbm %s2383_s0, 2048 }
  0x3f   : > { %s1740_s15 = scalar_lea.hbm %s2069_s17, 1024  ;;  %p1746_p9 = scmp.lt.u32.totalorder %s2069_s17, %s2383_s0 }
  0x40   : > { %p1741_p0 = scmp.ne.s32.totalorder %s2069_s17, %s1740_s15  ;;  %p1747_p1 = scmp.lt.u32.totalorder %s1745_s10, %s1740_s15 }
  0x41   : > { %p1749_p4 = scmp.lt.u32.totalorder %s1740_s15, %s2069_s17 }
  0x42   : > { %p1743_p5 = pnand %p1742_p3, %p1741_p0  ;;  %p1748_p2 = por %p1747_p1, %p1746_p9 }
  0x44   : > { %p1744_p7 = pneg %p1743_p5  ;;  %p1750_p6 = por %p1749_p4, %p1748_p2 }
  0x46   : > { %p1751_p8 = pnand %p1750_p6, %p1744_p7 }
  0x48   : > { %1754 = shalt.err (!%p1751_p8)
}
  0x49   : > { %s1755_s30 = scalar_lea.vmem %s2071_s8, 1024  ;;  %s1921_s12 = smov [#allocation2]  }
  0x4a   : > { %p1756_p12 = scmp.ne.s32.totalorder %s2071_s8, %s1755_s30  ;;  %s1760_s14 = sshll.u32 %s1921_s12, 4  ;;  %s1761_s14 = int_to_ptr.vmem [resolvable:$false] %s1760_s14 }
  0x4b   : > { %s1762_s16 = scalar_lea.vmem %s1761_s14, 2048  ;;  %p1763_p5 = scmp.lt.s32.totalorder %s2071_s8, %s1761_s14 }
  0x4c   : > { %p1758_p11 = pnand %p1756_p12, %p1742_p3  ;;  %p1764_p9 = scmp.lt.s32.totalorder %s1762_s16, %s1755_s30 }
  0x4e   : > { %p1759_p0 = pneg %p1758_p11  ;;  %p1765_p1 = por %p1764_p9, %p1763_p5 }
  0x50   : > { %p1766_p2 = pnand %p1765_p1, %p1759_p0 }
  0x52   : > { %1769 = shalt.err (!%p1766_p2)
}
  0x53   : > { %s1922_s15 = smov 64   ;;  %s1923_s10 = smov 4  }
  0x54   : > { %1601 = dma.hbm_to_vmem [thread:$0]  (!%p2075_p13), %s2069_s17, 1024, %s2071_s8, %s2079_s9, %s1922_s15, %s1922_s15, %s1923_s10  }
  0x55   : > { %p2385_p3 = scmp.ne.s32.totalorder %s2377_s28, 0 }
  0x56   : > { %s2110_s29 = sand.u32 (!%p2385_p3), 1, %s1900_s19   ;;  %p2386_p7 = scmp.ne.s32.totalorder (!%p2385_p3), %s2375_s26, 0 }
  0x57   : > { %251 = sbr.rel (%p2385_p3) target bundleno = 467 (0x1d3), region = 32  ;;  %s2113_s30 = sshll.u32 (!%p2385_p3), %s2110_s29, 6 }
  0x58   : > { %s254_s12 = scalar_lea.sflag (!%p2385_p3), [#allocation3], %s2110_s29  ;;  %s2117_s14 = scalar_lea.vmem (!%p2385_p3), [#allocation2], %s2113_s30 }
  0x5e   : > { %1879 = dma.done.wait (%p2386_p7), %s254_s12, 1024  }
  0x5f   : > { %1881 = vsyncadd (%p2386_p7), %s254_s12, 4294966272  ;;  %p2387_p13 = scmp.eq.s32.totalorder %s1991_s24, 0 }
  0x61   : > { %1883 = dma.done.wait (%p2387_p13), [#allocation6], 3072   ;;  %p2388_p4 = pmov %p2387_p13 }
  0x62   : > { %v1924_v0 = vmov 0   ;;  %v1672_v1 = vld [vmem:[#allocation5 + $0x4] ss:$12 sps:$4 sm:$0xff]   ;;  %v1674_v2 = vld [vmem:[#allocation5] ss:$12 sps:$4 sm:$0xff]   ;;  %v1706_v28 = vld [vmem:[%s2117_s14 + $0x18] sm:$0xff]   ;;  %v353_v33 = vlaneseq }
  0x63   : > { %1885 = vsyncadd (%p2388_p4), [#allocation6], 4294964224  ;;  %576 = vmatprep.mubr.bf16.mxu0 %v1924_v0  ;;  %544 = vmatprep.subr.bf16.mxu0 %v1672_v1  ;;  %v1675_v3 = vld [vmem:[#allocation5 + $0x1c] ss:$12 sps:$4 sm:$0xff]   ;;  %v1677_v4 = vld [vmem:[#allocation5 + $0x18] ss:$12 sps:$4 sm:$0xff]  }
  0x64   : > { %545 = vmatpush1.bf16.msra.mxu0 %v1674_v2  ;;  %v1678_v5 = vld [vmem:[#allocation5 + $0x34] ss:$12 sps:$4 sm:$0xff]   ;;  %v1680_v6 = vld [vmem:[#allocation5 + $0x30] ss:$12 sps:$4 sm:$0xff]   ;;  %v1681_v7 = vld [vmem:[#allocation5 + $0x4c] ss:$12 sps:$4 sm:$0xff]  }
  0x65   : > { %546 = vmatprep.subr.bf16.mxu0 %v1675_v3  ;;  %v1683_v8 = vld [vmem:[#allocation5 + $0x48] ss:$12 sps:$4 sm:$0xff]   ;;  %v1684_v9 = vld [vmem:[#allocation5 + $0x64] ss:$12 sps:$4 sm:$0xff]   ;;  %v1698_v12 = vld [vmem:[#allocation5 + $0x20] ss:$12 sps:$4 sm:$0xff]  }
  0x66   : > { %v1696_v10 = vld [vmem:[#allocation5 + $0x8] ss:$12 sps:$4 sm:$0xff]   ;;  %v1697_v11 = vld [vmem:[%s2117_s14] sm:$0xff]   ;;  %v1701_v17 = vld [vmem:[#allocation5 + $0x50] ss:$12 sps:$4 sm:$0xff]   ;;  %v354_v34 = vshrl.u32 %v353_v33, 7 }
  0x67   : > { %1550 = vmatprep.subr.bf16.mxu1 %v1696_v10  ;;  %v1686_v13 = vld [vmem:[#allocation5 + $0x60] ss:$12 sps:$4 sm:$0xff]   ;;  %1566 = vmatprep.mubr.bf16.mxu1 %v1697_v11  ;;  %v1699_v14 = vld [vmem:[#allocation5 + $0x38] ss:$12 sps:$4 sm:$0xff]   ;;  %v1687_v15 = vld [vmem:[#allocation5 + $0x7c] ss:$12 sps:$4 sm:$0xff]  }
  0x68   : > { %547 = vmatpush1.bf16.msra.mxu0 %v1677_v4  ;;  %1551 = vmatpush3.bf16.msra.mxu1 %v1696_v10  ;;  %v1689_v16 = vld [vmem:[#allocation5 + $0x78] ss:$12 sps:$4 sm:$0xff]   ;;  %v1690_v18 = vld [vmem:[#allocation5 + $0x94] ss:$12 sps:$4 sm:$0xff]   ;;  %v1692_v19 = vld [vmem:[#allocation5 + $0x90] ss:$12 sps:$4 sm:$0xff]  }
  0x69   : > { %548 = vmatprep.subr.bf16.mxu0 %v1678_v5  ;;  %1552 = vmatprep.subr.bf16.mxu1 %v1698_v12  ;;  %v1702_v20 = vld [vmem:[#allocation5 + $0x68] ss:$12 sps:$4 sm:$0xff]   ;;  %v1693_v21 = vld [vmem:[#allocation5 + $0xac] ss:$12 sps:$4 sm:$0xff]   ;;  %v1707_v25 = vld [vmem:[#allocation5 + $0xb0] ss:$12 sps:$4 sm:$0xff]  }
  0x6a   : > { %v1695_v22 = vld [vmem:[#allocation5 + $0xa8] ss:$12 sps:$4 sm:$0xff]   ;;  %v1704_v23 = vld [vmem:[#allocation5 + $0x80] ss:$12 sps:$4 sm:$0xff]   ;;  %v1705_v24 = vld [vmem:[#allocation5 + $0x98] ss:$12 sps:$4 sm:$0xff]  }
  0x6b   : > { %v1700_v26 = vld [vmem:[%s2117_s14 + $0x8] sm:$0xff]   ;;  %v1703_v27 = vld [vmem:[%s2117_s14 + $0x10] sm:$0xff]   ;;  %v1708_v29 = vld [vmem:[%s2117_s14 + $0x20] sm:$0xff]   ;;  %v355_v35 = vsub.s32 0, %v354_v34  ;;  %v359_v37 = vsub.s32 1, %v354_v34  ;;  %v363_v48 = vsub.s32 2, %v354_v34 }
  0x6c   : > { %549 = vmatpush1.bf16.msra.mxu0 %v1680_v6  ;;  %1553 = vmatpush3.bf16.msra.mxu1 %v1698_v12  ;;  %v1709_v30 = vld [vmem:[%s2117_s14 + $0x28] sm:$0xff]   ;;  %v1710_v31 = vld [vmem:[%s2117_s14 + $0x30] sm:$0xff]   ;;  %v1711_v32 = vld [vmem:[%s2117_s14 + $0x38] sm:$0xff]   ;;  %s2155_s17 = scalar_lea.vmem [#allocation8], %s2113_s30  ;;  %s2161_s8 = scalar_lea.vmem [#allocation7], %s2113_s30 }
  0x6d   : > { %550 = vmatprep.subr.bf16.mxu0 %v1681_v7  ;;  %1554 = vmatprep.subr.bf16.mxu1 %v1699_v14  ;;  %v351_v36 = vld [vmem:[%s2365_s2] sm:$0x7]  ;;  %s2176_s6 = scalar_lea.vmem [#allocation10], %s2113_s30  ;;  %s1036_s9 = sshll.u32 %s2161_s8, 4  ;;  %s2231_s9 = int_to_ptr.vmem [resolvable:$true] %s1036_s9 }
  0x6e   : > { %v2146_v38 = vrot.slane %v351_v36, %v355_v35  ;;  %v2148_v40 = vrot.slane %v351_v36, %v359_v37  ;;  %v2158_v54 = vrot.slane %v351_v36, %v363_v48  ;;  %s1054_s16 = sshll.u32 %s2155_s17, 4  ;;  %s1015_s15 = sand.u32 1, %s1991_s24   ;;  %s2235_s16 = int_to_ptr.vmem [resolvable:$true] %s1054_s16 }
  0x6f   : > { %s1390_s10 = sshll.u32 %s1908_s21, 10  ;;  %s1072_s30 = sshll.u32 %s2176_s6, 4  ;;  %s2250_s30 = int_to_ptr.vmem [resolvable:$true] %s1072_s30 }
  0x70   : > { %551 = vmatpush1.bf16.msra.mxu0 %v1683_v8  ;;  %1555 = vmatpush3.bf16.msra.mxu1 %v1699_v14  ;;  %s2243_s14 = scalar_lea.hbm %s2367_s4, %s1390_s10  ;;  %s2248_s28 = scalar_lea.hbm %s2366_s3, %s1390_s10 }
  0x71   : > { %552 = vmatprep.subr.bf16.mxu0 %v1684_v9  ;;  %1556 = vmatprep.subr.bf16.mxu1 %v1701_v17  ;;  %s2256_s0 = scalar_lea.hbm %s2368_s5, %s1390_s10  ;;  %s2259_s1 = scalar_lea.sflag [#allocation9], %s1015_s15 }
  0x72   : > { %s1770_s24 = scalar_lea.vmem %s2235_s16, 1024  ;;  %s1925_s12 = smov [#allocation8]  }
  0x73   : > { %p1771_p6 = scmp.ne.s32.totalorder %s2235_s16, %s1770_s24  ;;  %s1774_s21 = sshll.u32 %s1925_s12, 4  ;;  %s1775_s21 = int_to_ptr.vmem [resolvable:$false] %s1774_s21 }
  0x74   : > { %553 = vmatpush1.bf16.msra.mxu0 %v1686_v13  ;;  %1557 = vmatpush3.bf16.msra.mxu1 %v1701_v17  ;;  %s1776_s26 = scalar_lea.vmem %s1775_s21, 2048  ;;  %p1777_p11 = scmp.lt.s32.totalorder %s2235_s16, %s1775_s21 }
  0x75   : > { %554 = vmatprep.subr.bf16.mxu0 %v1687_v15  ;;  %1558 = vmatprep.subr.bf16.mxu1 %v1702_v20  ;;  %p1772_p8 = pnand %p1771_p6, %p2054_p10  ;;  %p1778_p0 = scmp.lt.s32.totalorder %s1776_s26, %s1770_s24 }
  0x77   : > { %p1773_p12 = pneg %p1772_p8  ;;  %p1779_p5 = por %p1778_p0, %p1777_p11 }
  0x78   : > { %555 = vmatpush1.bf16.msra.mxu0 %v1689_v16  ;;  %1559 = vmatpush3.bf16.msra.mxu1 %v1702_v20 }
  0x79   : > { %556 = vmatprep.subr.bf16.mxu0 %v1690_v18  ;;  %1560 = vmatprep.subr.bf16.mxu1 %v1704_v23  ;;  %p1780_p9 = pnand %p1779_p5, %p1773_p12 }
  0x7c   : > { %557 = vmatpush1.bf16.msra.mxu0 %v1692_v19  ;;  %1561 = vmatpush3.bf16.msra.mxu1 %v1704_v23 }
  0x7d   : > { %558 = vmatprep.subr.bf16.mxu0 %v1693_v21  ;;  %1562 = vmatprep.subr.bf16.mxu1 %v1705_v24 }
  0x80   : > { %559 = vmatpush1.bf16.msra.mxu0 %v1695_v22  ;;  %1563 = vmatpush3.bf16.msra.mxu1 %v1705_v24 }
  0x81   : > { %1564 = vmatprep.subr.bf16.mxu1 %v1707_v25 }
  0x83   : > { %577 = vmatmul.mubr.bf16.vlgmr.msra.gmra.mrb[0].mxu0 %v1697_v11 }
  0x84   : > { %586 = vmatprep.mubr.bf16.mxu0 %v1924_v0  ;;  %1565 = vmatpush3.bf16.msra.mxu1 %v1707_v25 }
  0x87   : > { %1567 = vmatmul.mubr.bf16.vlgmr.msra.gmra.mrb[0].mxu1 %v1700_v26 }
  0x88   : > { %1570 = vmatprep.mubr.bf16.mxu1 %v1703_v27 }
  0x8b   : > { %587 = vmatmul.mubr.bf16.gmra.mrb[4].mxu0 %v1700_v26 }
  0x8c   : > { %596 = vmatprep.mubr.bf16.mxu0 %v1924_v0 }
  0x8f   : > { %1571 = vmatmul.mubr.bf16.gmra.mrb[4].mxu1 %v1706_v28 }
  0x90   : > { %1574 = vmatprep.mubr.bf16.mxu1 %v1708_v29 }
  0x93   : > { %597 = vmatmul.mubr.bf16.gmra.mrb[8].mxu0 %v1703_v27 }
  0x94   : > { %606 = vmatprep.mubr.bf16.mxu0 %v1924_v0 }
  0x97   : > { %1575 = vmatmul.mubr.bf16.gmra.mrb[8].mxu1 %v1709_v30 }
  0x98   : > { %1578 = vmatprep.mubr.bf16.mxu1 %v1710_v31 }
  0x9b   : > { %607 = vmatmul.mubr.bf16.gmra.mrb[12].mxu0 %v1706_v28 }
  0x9c   : > { %616 = vmatprep.mubr.bf16.mxu0 %v1924_v0 }
  0x9f   : > { %1579 = vmatmul.mubr.bf16.gmra.mrb[12].mxu1 %v1711_v32 }
  0xa3   : > { %617 = vmatmul.mubr.bf16.gmra.mrb[16].mxu0 %v1708_v29 }
  0xa4   : > { %626 = vmatprep.mubr.bf16.mxu0 %v1924_v0 }
  0xab   : > { %627 = vmatmul.mubr.bf16.gmra.mrb[20].mxu0 %v1709_v30 }
  0xac   : > { %636 = vmatprep.mubr.bf16.mxu0 %v1924_v0 }
  0xb3   : > { %637 = vmatmul.mubr.bf16.gmra.mrb[24].mxu0 %v1710_v31 }
  0xb4   : > { %646 = vmatprep.mubr.bf16.mxu0 %v1924_v0 }
  0xbb   : > { %647 = vmatmul.mubr.bf16.gmra.mrb[28].mxu0 %v1711_v32 }
 0x156   : > { %v578_v39 = vpop.f32.mrb[0].mxu0 }
 0x157   : > { %v579_v41 = vadd.f32 %v578_v39, %v2146_v38  ;;  %v580_v42 = vpop.f32.mrb[1].mxu0 }
 0x158   : > { %v582_v43 = vpop.f32.mrb[2].mxu0  ;;  %v581_v46 = vadd.f32 %v580_v42, %v2148_v40 }
 0x159   : > { %v583_v44 = vadd.f32 %v582_v43, %v2146_v38  ;;  %v584_v45 = vpop.f32.mrb[3].mxu0  ;;  %v754_v49 = vmul.f32 0.17677669, %v579_v41 }
 0x15a   : > { %v585_v47 = vadd.f32 %v584_v45, %v2148_v40  ;;  %v1568_v60 = vpop.f32.mrb[0].mxu1 }
 0x15b   : > { %v755_v50 = vmul.f32 0.17677669, %v583_v44  ;;  %v700_v63 = vadd.f32 %v1568_v60, %v2158_v54  ;;  %v691_v0 = vpop.f32.mrb[1].mxu1 }
 0x15c   : > { %v1436_v51 = vpack.c.bf16 %v585_v47, %v581_v46  ;;  %v692_v3 = vadd.f32 %v691_v0, %v2158_v54  ;;  %v1569_v4 = vpop.f32.mrb[2].mxu1 }
 0x15d   : > { %v1396_v52 = vpack.c.bf16 %v755_v50, %v754_v49  ;;  %v703_v6 = vadd.f32 %v1569_v4, %v2158_v54  ;;  %v694_v7 = vpop.f32.mrb[3].mxu1 }
 0x15e   : > { %1437 = vst [vmem:[%s2155_s17] sm:$0xff] %v1436_v51   ;;  %v588_v53 = vpop.f32.mrb[4].mxu0  ;;  %v695_v9 = vadd.f32 %v694_v7, %v2158_v54 }
 0x15f   : > { %1397 = vst [vmem:[%s2161_s8] sm:$0xff] %v1396_v52   ;;  %v589_v55 = vadd.f32 %v588_v53, %v2146_v38  ;;  %v590_v56 = vpop.f32.mrb[5].mxu0  ;;  %v1481_v11 = vpack.c.bf16 %v703_v6, %v700_v63 }
 0x160   : > { %v592_v57 = vpop.f32.mrb[6].mxu0  ;;  %v591_v61 = vadd.f32 %v590_v56, %v2148_v40  ;;  %v1476_v14 = vpack.c.bf16 %v695_v9, %v692_v3 }
 0x161   : > { %v593_v58 = vadd.f32 %v592_v57, %v2146_v38  ;;  %v594_v59 = vpop.f32.mrb[7].mxu0  ;;  %v756_v1 = vmul.f32 0.17677669, %v589_v55  ;;  %1527 = vst [vmem:[%s2176_s6 + $0x8] sm:$0xff] %v1481_v11  }
 0x162   : > { %v595_v62 = vadd.f32 %v594_v59, %v2148_v40  ;;  %1477 = vst [vmem:[%s2176_s6] sm:$0xff] %v1476_v14   ;;  %v1572_v18 = vpop.f32.mrb[4].mxu1 }
 0x163   : > { %v757_v2 = vmul.f32 0.17677669, %v593_v58  ;;  %v716_v21 = vadd.f32 %v1572_v18, %v2158_v54  ;;  %v707_v22 = vpop.f32.mrb[5].mxu1 }
 0x164   : > { %v1441_v5 = vpack.c.bf16 %v595_v62, %v591_v61  ;;  %v708_v25 = vadd.f32 %v707_v22, %v2158_v54  ;;  %v1573_v26 = vpop.f32.mrb[6].mxu1 }
 0x165   : > { %v1401_v8 = vpack.c.bf16 %v757_v2, %v756_v1  ;;  %v719_v28 = vadd.f32 %v1573_v26, %v2158_v54  ;;  %v710_v29 = vpop.f32.mrb[7].mxu1 }
 0x166   : > { %1520 = vst [vmem:[%s2155_s17 + $0x8] sm:$0xff] %v1441_v5   ;;  %v598_v10 = vpop.f32.mrb[8].mxu0  ;;  %v711_v31 = vadd.f32 %v710_v29, %v2158_v54 }
 0x167   : > { %1513 = vst [vmem:[%s2161_s8 + $0x8] sm:$0xff] %v1401_v8   ;;  %v599_v12 = vadd.f32 %v598_v10, %v2146_v38  ;;  %v600_v13 = vpop.f32.mrb[9].mxu0  ;;  %v1491_v33 = vpack.c.bf16 %v719_v28, %v716_v21 }
 0x168   : > { %v602_v15 = vpop.f32.mrb[10].mxu0  ;;  %v601_v19 = vadd.f32 %v600_v13, %v2148_v40  ;;  %v1486_v36 = vpack.c.bf16 %v711_v31, %v708_v25 }
 0x169   : > { %v603_v16 = vadd.f32 %v602_v15, %v2146_v38  ;;  %v604_v17 = vpop.f32.mrb[11].mxu0  ;;  %v758_v23 = vmul.f32 0.17677669, %v599_v12  ;;  %1529 = vst [vmem:[%s2176_s6 + $0x18] sm:$0xff] %v1491_v33  }
 0x16a   : > { %v605_v20 = vadd.f32 %v604_v17, %v2148_v40  ;;  %1528 = vst [vmem:[%s2176_s6 + $0x10] sm:$0xff] %v1486_v36   ;;  %v1576_v42 = vpop.f32.mrb[8].mxu1 }
 0x16b   : > { %v759_v24 = vmul.f32 0.17677669, %v603_v16  ;;  %v732_v45 = vadd.f32 %v1576_v42, %v2158_v54  ;;  %v723_v46 = vpop.f32.mrb[9].mxu1 }
 0x16c   : > { %v1446_v27 = vpack.c.bf16 %v605_v20, %v601_v19  ;;  %v724_v49 = vadd.f32 %v723_v46, %v2158_v54  ;;  %v1577_v50 = vpop.f32.mrb[10].mxu1 }
 0x16d   : > { %v1406_v30 = vpack.c.bf16 %v759_v24, %v758_v23  ;;  %v735_v52 = vadd.f32 %v1577_v50, %v2158_v54  ;;  %v726_v53 = vpop.f32.mrb[11].mxu1 }
 0x16e   : > { %1521 = vst [vmem:[%s2155_s17 + $0x10] sm:$0xff] %v1446_v27   ;;  %v608_v32 = vpop.f32.mrb[12].mxu0  ;;  %v727_v56 = vadd.f32 %v726_v53, %v2158_v54 }
 0x16f   : > { %1514 = vst [vmem:[%s2161_s8 + $0x10] sm:$0xff] %v1406_v30   ;;  %v609_v34 = vadd.f32 %v608_v32, %v2146_v38  ;;  %v610_v35 = vpop.f32.mrb[13].mxu0  ;;  %v1501_v58 = vpack.c.bf16 %v735_v52, %v732_v45 }
 0x170   : > { %v612_v37 = vpop.f32.mrb[14].mxu0  ;;  %v611_v43 = vadd.f32 %v610_v35, %v2148_v40  ;;  %v1496_v61 = vpack.c.bf16 %v727_v56, %v724_v49 }
 0x171   : > { %v613_v39 = vadd.f32 %v612_v37, %v2146_v38  ;;  %v614_v41 = vpop.f32.mrb[15].mxu0  ;;  %v760_v47 = vmul.f32 0.17677669, %v609_v34  ;;  %1531 = vst [vmem:[%s2176_s6 + $0x28] sm:$0xff] %v1501_v58  }
 0x172   : > { %v615_v44 = vadd.f32 %v614_v41, %v2148_v40  ;;  %1530 = vst [vmem:[%s2176_s6 + $0x20] sm:$0xff] %v1496_v61   ;;  %v1580_v1 = vpop.f32.mrb[12].mxu1 }
 0x173   : > { %v761_v48 = vmul.f32 0.17677669, %v613_v39  ;;  %v748_v4 = vadd.f32 %v1580_v1, %v2158_v54  ;;  %v739_v5 = vpop.f32.mrb[13].mxu1 }
 0x174   : > { %v1451_v51 = vpack.c.bf16 %v615_v44, %v611_v43  ;;  %v740_v8 = vadd.f32 %v739_v5, %v2158_v54  ;;  %v1581_v9 = vpop.f32.mrb[14].mxu1 }
 0x175   : > { %v1411_v55 = vpack.c.bf16 %v761_v48, %v760_v47  ;;  %v751_v11 = vadd.f32 %v1581_v9, %v2158_v54  ;;  %v742_v12 = vpop.f32.mrb[15].mxu1 }
 0x176   : > { %1522 = vst [vmem:[%s2155_s17 + $0x18] sm:$0xff] %v1451_v51   ;;  %v618_v57 = vpop.f32.mrb[16].mxu0  ;;  %v743_v14 = vadd.f32 %v742_v12, %v2158_v54 }
 0x177   : > { %1515 = vst [vmem:[%s2161_s8 + $0x18] sm:$0xff] %v1411_v55   ;;  %v619_v59 = vadd.f32 %v618_v57, %v2146_v38  ;;  %v620_v60 = vpop.f32.mrb[17].mxu0  ;;  %v1511_v16 = vpack.c.bf16 %v751_v11, %v748_v4 }
 0x178   : > { %v622_v62 = vpop.f32.mrb[18].mxu0  ;;  %v621_v2 = vadd.f32 %v620_v60, %v2148_v40  ;;  %v1506_v19 = vpack.c.bf16 %v743_v14, %v740_v8 }
 0x179   : > { %v623_v63 = vadd.f32 %v622_v62, %v2146_v38  ;;  %v624_v0 = vpop.f32.mrb[19].mxu0  ;;  %v762_v6 = vmul.f32 0.17677669, %v619_v59  ;;  %1533 = vst [vmem:[%s2176_s6 + $0x38] sm:$0xff] %v1511_v16  }
 0x17a   : > { %v625_v3 = vadd.f32 %v624_v0, %v2148_v40  ;;  %1532 = vst [vmem:[%s2176_s6 + $0x30] sm:$0xff] %v1506_v19  }
 0x17b   : > { %v763_v7 = vmul.f32 0.17677669, %v623_v63 }
 0x17c   : > { %v1456_v10 = vpack.c.bf16 %v625_v3, %v621_v2 }
 0x17d   : > { %v1416_v13 = vpack.c.bf16 %v763_v7, %v762_v6 }
 0x17e   : > { %1523 = vst [vmem:[%s2155_s17 + $0x20] sm:$0xff] %v1456_v10   ;;  %v628_v15 = vpop.f32.mrb[20].mxu0 }
 0x17f   : > { %1516 = vst [vmem:[%s2161_s8 + $0x20] sm:$0xff] %v1416_v13   ;;  %v629_v17 = vadd.f32 %v628_v15, %v2146_v38  ;;  %v630_v18 = vpop.f32.mrb[21].mxu0 }
 0x180   : > { %v632_v20 = vpop.f32.mrb[22].mxu0  ;;  %v631_v23 = vadd.f32 %v630_v18, %v2148_v40 }
 0x181   : > { %v633_v21 = vadd.f32 %v632_v20, %v2146_v38  ;;  %v634_v22 = vpop.f32.mrb[23].mxu0  ;;  %v764_v24 = vmul.f32 0.17677669, %v629_v17 }
 0x182   : > { %v635_v54 = vadd.f32 %v634_v22, %v2148_v40 }
 0x183   : > { %v765_v25 = vmul.f32 0.17677669, %v633_v21 }
 0x184   : > { %v1461_v26 = vpack.c.bf16 %v635_v54, %v631_v23 }
 0x185   : > { %v1421_v27 = vpack.c.bf16 %v765_v25, %v764_v24 }
 0x186   : > { %1524 = vst [vmem:[%s2155_s17 + $0x28] sm:$0xff] %v1461_v26   ;;  %v638_v28 = vpop.f32.mrb[24].mxu0 }
 0x187   : > { %1517 = vst [vmem:[%s2161_s8 + $0x28] sm:$0xff] %v1421_v27   ;;  %v639_v29 = vadd.f32 %v638_v28, %v2146_v38  ;;  %v640_v30 = vpop.f32.mrb[25].mxu0 }
 0x188   : > { %v642_v31 = vpop.f32.mrb[26].mxu0  ;;  %v641_v34 = vadd.f32 %v640_v30, %v2148_v40 }
 0x189   : > { %v643_v32 = vadd.f32 %v642_v31, %v2146_v38  ;;  %v644_v33 = vpop.f32.mrb[27].mxu0  ;;  %v766_v36 = vmul.f32 0.17677669, %v639_v29 }
 0x18a   : > { %v645_v35 = vadd.f32 %v644_v33, %v2148_v40 }
 0x18b   : > { %v767_v37 = vmul.f32 0.17677669, %v643_v32 }
 0x18c   : > { %v1466_v39 = vpack.c.bf16 %v645_v35, %v641_v34 }
 0x18d   : > { %v1426_v41 = vpack.c.bf16 %v767_v37, %v766_v36 }
 0x18e   : > { %1525 = vst [vmem:[%s2155_s17 + $0x30] sm:$0xff] %v1466_v39   ;;  %v648_v42 = vpop.f32.mrb[28].mxu0 }
 0x18f   : > { %1518 = vst [vmem:[%s2161_s8 + $0x30] sm:$0xff] %v1426_v41   ;;  %v649_v43 = vadd.f32 %v648_v42, %v2146_v38  ;;  %v650_v44 = vpop.f32.mrb[29].mxu0 }
 0x190   : > { %v652_v45 = vpop.f32.mrb[30].mxu0  ;;  %v651_v48 = vadd.f32 %v650_v44, %v2148_v40 }
 0x191   : > { %v653_v46 = vadd.f32 %v652_v45, %v2146_v38  ;;  %v654_v47 = vpop.f32.mrb[31].mxu0  ;;  %v768_v50 = vmul.f32 0.17677669, %v649_v43 }
 0x192   : > { %v655_v49 = vadd.f32 %v654_v47, %v2148_v40 }
 0x193   : > { %v769_v51 = vmul.f32 0.17677669, %v653_v46 }
 0x194   : > { %v1471_v52 = vpack.c.bf16 %v655_v49, %v651_v48 }
 0x195   : > { %v1431_v38 = vpack.c.bf16 %v769_v51, %v768_v50 }
 0x196   : > { %1526 = vst [vmem:[%s2155_s17 + $0x38] sm:$0xff] %v1471_v52  }
 0x197   : > { %1519 = vst [vmem:[%s2161_s8 + $0x38] sm:$0xff] %v1431_v38  }
 0x198   : > { %1783 = shalt.err (!%p1780_p9)
}
 0x199   : > { %s1784_s25 = scalar_lea.hbm %s2243_s14, 1024  ;;  %s1788_s15 = scalar_lea.hbm %s2367_s4, 2048 }
 0x19a   : > { %p1785_p1 = scmp.ne.s32.totalorder %s2243_s14, %s1784_s25  ;;  %p1789_p7 = scmp.lt.u32.totalorder %s2243_s14, %s2367_s4 }
 0x19b   : > { %p1790_p13 = scmp.lt.u32.totalorder %s1788_s15, %s1784_s25  ;;  %p1792_p6 = scmp.lt.u32.totalorder %s1784_s25, %s2243_s14 }
 0x19c   : > { %p1786_p2 = pnand %p1785_p1, %p2054_p10 }
 0x19d   : > { %p1791_p4 = por %p1790_p13, %p1789_p7 }
 0x19e   : > { %p1787_p3 = pneg %p1786_p2 }
 0x19f   : > { %p1793_p8 = por %p1792_p6, %p1791_p4 }
 0x1a1   : > { %p1794_p12 = pnand %p1793_p8, %p1787_p3 }
 0x1a3   : > { %1797 = shalt.err (!%p1794_p12)
}
 0x1a4   : > { %s1926_s24 = smov 64   ;;  %s1927_s12 = smov 4  }
 0x1a5   : > { %1589 = dma.vmem_to_hbm [thread:$0]  (%p2054_p10), %s2235_s16, 1024, %s2243_s14, %s2259_s1, %s1926_s24, %s1926_s24, %s1927_s12  }
 0x1a6   : > { %s1011_s21 = scalar_lea.sflag [#allocation4], %s2110_s29  ;;  %s1798_s26 = scalar_lea.vmem %s2231_s9, 1024 }
 0x1a7   : > { %p1799_p11 = scmp.ne.s32.totalorder %s2231_s9, %s1798_s26  ;;  %s1928_s25 = smov [#allocation7]  }
 0x1a8   : > { %s1802_s17 = sshll.u32 %s1928_s25, 4  ;;  %s1803_s17 = int_to_ptr.vmem [resolvable:$false] %s1802_s17 }
 0x1a9   : > { %p1800_p0 = pnand %p1799_p11, %p2054_p10  ;;  %s1804_s8 = scalar_lea.vmem %s1803_s17, 2048 }
 0x1aa   : > { %p1805_p9 = scmp.lt.s32.totalorder %s2231_s9, %s1803_s17  ;;  %p1806_p1 = scmp.lt.s32.totalorder %s1804_s8, %s1798_s26 }
 0x1ab   : > { %p1801_p5 = pneg %p1800_p0 }
 0x1ac   : > { %p1807_p2 = por %p1806_p1, %p1805_p9 }
 0x1ae   : > { %p1808_p3 = pnand %p1807_p2, %p1801_p5 }
 0x1b0   : > { %1811 = shalt.err (!%p1808_p3)
}
 0x1b1   : > { %s1812_s16 = scalar_lea.hbm %s2248_s28, 1024  ;;  %s1816_s10 = scalar_lea.hbm %s2366_s3, 2048 }
 0x1b2   : > { %p1813_p7 = scmp.ne.s32.totalorder %s2248_s28, %s1812_s16  ;;  %p1817_p6 = scmp.lt.u32.totalorder %s2248_s28, %s2366_s3 }
 0x1b3   : > { %p1818_p8 = scmp.lt.u32.totalorder %s1816_s10, %s1812_s16  ;;  %p1820_p11 = scmp.lt.u32.totalorder %s1812_s16, %s2248_s28 }
 0x1b4   : > { %p1814_p13 = pnand %p1813_p7, %p2054_p10 }
 0x1b5   : > { %p1819_p12 = por %p1818_p8, %p1817_p6 }
 0x1b6   : > { %p1815_p4 = pneg %p1814_p13 }
 0x1b7   : > { %p1821_p0 = por %p1820_p11, %p1819_p12 }
 0x1b9   : > { %p1822_p5 = pnand %p1821_p0, %p1815_p4 }
 0x1bb   : > { %1825 = shalt.err (!%p1822_p5)
}
 0x1bc   : > { %1588 = dma.vmem_to_hbm [thread:$0]  (%p2054_p10), %s2231_s9, 1024, %s2248_s28, %s1011_s21, %s1926_s24, %s1926_s24, %s1927_s12  }
 0x1bd   : > { %s1826_s26 = scalar_lea.vmem %s2250_s30, 1024  ;;  %s1929_s17 = smov [#allocation10]  }
 0x1be   : > { %p1827_p9 = scmp.ne.s32.totalorder %s2250_s30, %s1826_s26  ;;  %s1830_s8 = sshll.u32 %s1929_s17, 4  ;;  %s1831_s8 = int_to_ptr.vmem [resolvable:$false] %s1830_s8 }
 0x1bf   : > { %s1832_s16 = scalar_lea.vmem %s1831_s8, 2048  ;;  %p1833_p3 = scmp.lt.s32.totalorder %s2250_s30, %s1831_s8 }
 0x1c0   : > { %p1828_p1 = pnand %p1827_p9, %p2054_p10  ;;  %p1834_p7 = scmp.lt.s32.totalorder %s1832_s16, %s1826_s26 }
 0x1c2   : > { %p1829_p2 = pneg %p1828_p1  ;;  %p1835_p13 = por %p1834_p7, %p1833_p3 }
 0x1c4   : > { %p1836_p4 = pnand %p1835_p13, %p1829_p2 }
 0x1c6   : > { %1839 = shalt.err (!%p1836_p4)
}
 0x1c7   : > { %s1840_s29 = scalar_lea.hbm %s2256_s0, 1024  ;;  %s1844_s21 = scalar_lea.hbm %s2368_s5, 2048 }
 0x1c8   : > { %p1841_p6 = scmp.ne.s32.totalorder %s2256_s0, %s1840_s29  ;;  %p1845_p11 = scmp.lt.u32.totalorder %s2256_s0, %s2368_s5 }
 0x1c9   : > { %p1846_p0 = scmp.lt.u32.totalorder %s1844_s21, %s1840_s29  ;;  %p1848_p9 = scmp.lt.u32.totalorder %s1840_s29, %s2256_s0 }
 0x1ca   : > { %p1842_p8 = pnand %p1841_p6, %p2054_p10 }
 0x1cb   : > { %p1847_p5 = por %p1846_p0, %p1845_p11 }
 0x1cc   : > { %p1843_p12 = pneg %p1842_p8 }
 0x1cd   : > { %p1849_p1 = por %p1848_p9, %p1847_p5 }
 0x1cf   : > { %p1850_p2 = pnand %p1849_p1, %p1843_p12 }
 0x1d1   : > { %1853 = shalt.err (!%p1850_p2)
}
 0x1d2   : > { %1590 = dma.vmem_to_hbm [thread:$0]  (%p2054_p10), %s2250_s30, 1024, %s2256_s0, %s2259_s1, %s1926_s24, %s1926_s24, %s1927_s12  }
 0x1d3 PF: > { %s1087_s10 = sand.u32 1, %s1896_s18   ;;  %p2389_p3 = scmp.ne.s32.totalorder %s2376_s27, 0 }
 0x1d4   : > { %p2390_p7 = scmp.ge.s32.totalorder %s1916_s23, 2  ;;  %s1088_s6 = scalar_lea.sflag [#allocation4], %s1087_s10 }
 0x1d6   : > { %p1603_p13 = pnand %p2390_p7, %p2389_p3 }
 0x1d8   : > { %1887 = dma.done.wait (!%p1603_p13), %s1088_s6, 1024  }
 0x1d9   : > { %1889 = vsyncadd (!%p1603_p13), %s1088_s6, 4294966272  ;;  %s2391_s11 = sadd.s32 4294967294, %s1916_s23  }
 0x1da   : > { %s1096_s25 = sand.u32 1, %s2391_s11  }
 0x1db   : > { %s1097_s26 = scalar_lea.sflag [#allocation9], %s1096_s25 }
 0x1dc   : > { %1891 = dma.done.wait (!%p1603_p13), %s1097_s26, 2048  }
 0x1dd   : > { %1893 = vsyncadd (!%p1603_p13), %s1097_s26, 4294965248  ;;  %s26_s23 = sadd.s32 1, %s1916_s23   ;;  %s2392_s18 = smov %s1900_s19 }
 0x1de   : > { %p23_p10 = scmp.ge.s32.totalorder %s26_s23, 4   ;;  %s2393_s19 = smov %s1904_s20 }
 0x1df   : > { %s2394_s20 = smov %s2063_s13  ;;  %s2395_s21 = smov %s1912_s22 }
 0x1e0   : > { %s2396_s22 = smov %s2398_s7  ;;  %25 = sbr.rel (!%p23_p10) target bundleno = 12 (0xc), region = 113 }
 0x1e7   :  { %1111 = vsyncpa [#allocation3], 1 }
 0x1e8   :  { %1113 = vsyncpa [#allocation3 + $0x1], 1 }
 0x1e9   :  { %1114 = vsyncpa [#allocation6], 1 }
 0x1ea   :  { %1115 = vsyncpa [#allocation4], 1 }
 0x1eb   :  { %1117 = vsyncpa [#allocation4 + $0x1], 1 }
 0x1ec   :  { %1118 = vsyncpa [#allocation9], 1 }
 0x1ed   :  { %1120 = vsyncpa [#allocation9 + $0x1], 1 }

</bundles_post_ra>
